<compile_context>
chip_gen: v5e
topology: v5e:2x2
jax: 0.10.0
libtpu: 0.0.40
codegen_flags: <defaults>
</compile_context>

<pallas_src>
import jax
import jax.numpy as jnp
import numpy as np
from jax.experimental import pallas as pl
from jax.experimental.pallas import tpu as pltpu


def _bigru_kernel(len_ref, xf_ref, xb_ref,
                  whh_f_ref, bhh_f_ref, whh_b_ref, bhh_b_ref,
                  out_f_ref, out_b_ref, hid_ref,
                  h_f_ref, h_b_ref):
    t_blk = pl.program_id(1)
    nT = pl.num_programs(1)
    Tt, Bt, _ = xf_ref.shape
    Hp = h_f_ref.shape[1]
    T_pad = nT * Tt

    lengths = len_ref[...]                       # (Bt, 1) int32, VMEM-resident

    @pl.when(t_blk == 0)
    def _():
        h_f_ref[...] = jnp.zeros_like(h_f_ref)
        h_b_ref[...] = jnp.zeros_like(h_b_ref)

    whh_f = whh_f_ref[...]                       # (Hp, 3Hp) bf16
    bhh_f = bhh_f_ref[...]                       # (1, 3Hp)  f32
    whh_b = whh_b_ref[...]
    bhh_b = bhh_b_ref[...]

    def gru_step(xproj, h, whh, bhh):
        # xproj: (Bt, 3Hp) f32, already = x @ W_ih + b_ih  (gates [r|z|n])
        hh = jnp.dot(h.astype(jnp.bfloat16), whh,
                     preferred_element_type=jnp.float32) + bhh
        r = jax.nn.sigmoid(xproj[:, 0 * Hp:1 * Hp] + hh[:, 0 * Hp:1 * Hp])
        z = jax.nn.sigmoid(xproj[:, 1 * Hp:2 * Hp] + hh[:, 1 * Hp:2 * Hp])
        # n-gate: b_hh_n is inside hh, i.e. multiplied by r (PyTorch semantics)
        n = jnp.tanh(xproj[:, 2 * Hp:3 * Hp] + r * hh[:, 2 * Hp:3 * Hp])
        return (1.0 - z) * n + z * h

    def body(tt, carry):
        h_f, h_b = carry

        # ---- forward direction, absolute time t_blk*Tt + tt ----
        t_abs_f = t_blk * Tt + tt
        xf = xf_ref[tt].astype(jnp.float32)                  # (Bt, 3Hp)
        h_f_new = gru_step(xf, h_f, whh_f, bhh_f)
        valid_f = t_abs_f < lengths                          # (Bt, 1) bool
        h_f = jnp.where(valid_f, h_f_new, h_f)
        out_f_ref[tt] = jnp.where(valid_f, h_f, 0.0)

        # ---- backward direction, absolute time T_pad-1 - (t_blk*Tt + tt) ----
        tt_b = Tt - 1 - tt
        t_abs_b = T_pad - 1 - (t_blk * Tt + tt)
        xb = xb_ref[tt_b].astype(jnp.float32)
        h_b_new = gru_step(xb, h_b, whh_b, bhh_b)
        valid_b = t_abs_b < lengths
        h_b = jnp.where(valid_b, h_b_new, h_b)
        out_b_ref[tt_b] = jnp.where(valid_b, h_b, 0.0)

        return h_f, h_b

    h_f, h_b = jax.lax.fori_loop(0, Tt, body,
                                 (h_f_ref[...], h_b_ref[...]), unroll=True)
    h_f_ref[...] = h_f
    h_b_ref[...] = h_b

    @pl.when(t_blk == nT - 1)
    def _():
        hid_ref[0] = h_f       # forward final hidden (frozen after last valid step)
        hid_ref[1] = h_b       # backward final hidden (after processing time 0)


def _round_up(x, m):
    return (x + m - 1) // m * m


def _pack_gate_weight(w3, H, Hp):
    """(3, H, H) gates [r, z, n] -> (Hp, 3*Hp) bf16, each gate in its own
    128-aligned column block (zero padded)."""
    wp = jnp.zeros((Hp, 3 * Hp), jnp.float32)
    for g in range(3):
        wp = wp.at[:H, g * Hp:g * Hp + H].set(w3[g])
    return wp.astype(jnp.bfloat16)


def _pack_gate_bias(b3, H, Hp):
    """(3, 1, H) -> (1, 3*Hp) f32."""
    bp = jnp.zeros((1, 3 * Hp), jnp.float32)
    for g in range(3):
        bp = bp.at[:, g * Hp:g * Hp + H].set(b3[g])
    return bp


def encoder_rnn_forward(input_seq, input_lengths, emb_table, params,
                        *, time_block=4, batch_block=None):
    T, B = input_seq.shape
    H = emb_table.shape[1]

    Hp = _round_up(max(H, 128), 128)             # lane-aligned feature dim
    Bp = _round_up(max(B, 8), 8)                 # sublane-aligned batch dim
    Tt = min(time_block, T)                      # timesteps per grid iteration
    Tp = _round_up(T, Tt)
    nT = Tp // Tt
    Bt = Bp if batch_block is None else min(batch_block, Bp)
    assert Bp % Bt == 0
    nB = Bp // Bt

    f32, bf16 = jnp.float32, jnp.bfloat16

    # -------- glue: embedding gather + padding (plain JAX) ------------------
    # TODO(synk): embedding gather + pack_padded bookkeeping stay in XLA;
    # packing semantics are reproduced in-kernel via length masking.
    embedded = emb_table[input_seq].astype(f32)                      # (T, B, H)
    x = jnp.zeros((Tp, Bp, Hp), f32).at[:T, :B, :H].set(embedded)
    x_bf = x.astype(bf16)

    lengths = jnp.zeros((Bp, 1), jnp.int32).at[:B, 0].set(
        input_lengths.astype(jnp.int32))

    # -------- hoisted input projections (one big MXU matmul per direction) --
    wih_f = _pack_gate_weight(params["wih_f"], H, Hp)
    wih_b = _pack_gate_weight(params["wih_b"], H, Hp)
    bih_f = _pack_gate_bias(params["bih_f"], H, Hp)
    bih_b = _pack_gate_bias(params["bih_b"], H, Hp)
    whh_f = _pack_gate_weight(params["whh_f"], H, Hp)
    whh_b = _pack_gate_weight(params["whh_b"], H, Hp)
    bhh_f = _pack_gate_bias(params["bhh_f"], H, Hp)
    bhh_b = _pack_gate_bias(params["bhh_b"], H, Hp)

    x2d = x_bf.reshape(Tp * Bp, Hp)
    xproj_f = (jnp.dot(x2d, wih_f, preferred_element_type=f32) + bih_f
               ).astype(bf16).reshape(Tp, Bp, 3 * Hp)
    xproj_b = (jnp.dot(x2d, wih_b, preferred_element_type=f32) + bih_b
               ).astype(bf16).reshape(Tp, Bp, 3 * Hp)

    # -------- recurrent Pallas kernel ---------------------------------------
    fwd_idx = lambda b, t: (t, b, 0)
    bwd_idx = lambda b, t: (nT - 1 - t, b, 0)
    w_idx = lambda b, t: (0, 0)

    grid_spec = pltpu.PrefetchScalarGridSpec(
        num_scalar_prefetch=0,
        grid=(nB, nT),
        in_specs=[
            pl.BlockSpec((Bt, 1), lambda b, t: (b, 0)),          # lengths
            pl.BlockSpec((Tt, Bt, 3 * Hp), fwd_idx),             # xproj fwd
            pl.BlockSpec((Tt, Bt, 3 * Hp), bwd_idx),             # xproj bwd (reversed blocks)
            pl.BlockSpec((Hp, 3 * Hp), w_idx),                   # W_hh fwd (gates fused)
            pl.BlockSpec((1, 3 * Hp), w_idx),                    # b_hh fwd
            pl.BlockSpec((Hp, 3 * Hp), w_idx),                   # W_hh bwd
            pl.BlockSpec((1, 3 * Hp), w_idx),                    # b_hh bwd
        ],
        out_specs=[
            pl.BlockSpec((Tt, Bt, Hp), fwd_idx),                 # forward outputs
            pl.BlockSpec((Tt, Bt, Hp), bwd_idx),                 # backward outputs
            pl.BlockSpec((2, Bt, Hp), lambda b, t: (0, b, 0)),   # final hidden
        ],
        scratch_shapes=[pltpu.VMEM((Bt, Hp), f32),               # h_fwd
                        pltpu.VMEM((Bt, Hp), f32)],              # h_bwd
    )

    out_f, out_b, hidden = pl.pallas_call(
        _bigru_kernel,
        grid_spec=grid_spec,
        out_shape=(jax.ShapeDtypeStruct((Tp, Bp, Hp), f32),
                   jax.ShapeDtypeStruct((Tp, Bp, Hp), f32),
                   jax.ShapeDtypeStruct((2, Bp, Hp), f32)),
        compiler_params=pltpu.CompilerParams(
            dimension_semantics=("parallel", "arbitrary"),
            vmem_limit_bytes=32 * 1024 * 1024),
    )(lengths, xproj_f, xproj_b, whh_f, bhh_f, whh_b, bhh_b)

    # outputs[:, :, :H] + outputs[:, :, H:] of the PyTorch module == fwd + bwd;
    # one fused XLA elementwise pass, then strip padding.
    outputs = (out_f + out_b)[:T, :B, :H]
    hidden = hidden[:, :B, :H]
    return outputs, hidden


# ---------------- pure-JAX reference (mirrors the kernel math) ----------------
def ref_forward(x_emb, input_lengths, params):
    T, B, H = x_emb.shape
    f32, bf16 = jnp.float32, jnp.bfloat16
    lengths = input_lengths.astype(jnp.int32)

    pack_w = lambda w3: jnp.concatenate([w3[0], w3[1], w3[2]], axis=1)  # (H, 3H)
    pack_b = lambda b3: jnp.concatenate([b3[0], b3[1], b3[2]], axis=1)  # (1, 3H)

    def run(wih, bih, whh, bhh, reverse):
        wih_c = pack_w(wih).astype(bf16)
        whh_c = pack_w(whh).astype(bf16)
        bih_c, bhh_c = pack_b(bih), pack_b(bhh)
        xproj = (jnp.dot(x_emb.reshape(T * B, H).astype(bf16), wih_c,
                         preferred_element_type=f32) + bih_c)
        xproj = xproj.astype(bf16).astype(f32).reshape(T, B, 3 * H)

        h = jnp.zeros((B, H), f32)
        outs = [None] * T
        order = range(T - 1, -1, -1) if reverse else range(T)
        for t in order:
            hh = jnp.dot(h.astype(bf16), whh_c, preferred_element_type=f32) + bhh_c
            xp = xproj[t]
            r = jax.nn.sigmoid(xp[:, :H] + hh[:, :H])
            z = jax.nn.sigmoid(xp[:, H:2 * H] + hh[:, H:2 * H])
            n = jnp.tanh(xp[:, 2 * H:] + r * hh[:, 2 * H:])
            h_new = (1.0 - z) * n + z * h
            m = (t < lengths)[:, None]
            h = jnp.where(m, h_new, h)
            outs[t] = jnp.where(m, h, 0.0)
        return jnp.stack(outs), h

    of, hf = run(params["wih_f"], params["bih_f"],
                 params["whh_f"], params["bhh_f"], reverse=False)
    ob, hb = run(params["wih_b"], params["bih_b"],
                 params["whh_b"], params["bhh_b"], reverse=True)
    return of + ob, jnp.stack([hf, hb])


if __name__ == "__main__":
    V, H, T, B = 50, 32, 8, 2                 # hidden_size=32 stand-in for 500
    key = jax.random.PRNGKey(0)
    keys = jax.random.split(key, 11)

    emb_table = jax.random.normal(keys[0], (V, H), jnp.float32)  # nn.Embedding ~ N(0,1)
    s = 1.0 / float(np.sqrt(H))                                  # GRU init U(-1/sqrt(H), 1/sqrt(H))
    u = lambda k, shp: jax.random.uniform(k, shp, jnp.float32, -s, s)

    params = {
        # (3, H, H) gates [r, z, n], already transposed so x @ W works
        "wih_f": u(keys[1], (3, H, H)), "whh_f": u(keys[2], (3, H, H)),
        "bih_f": u(keys[3], (3, 1, H)), "bhh_f": u(keys[4], (3, 1, H)),
        "wih_b": u(keys[5], (3, H, H)), "whh_b": u(keys[6], (3, H, H)),
        "bih_b": u(keys[7], (3, 1, H)), "bhh_b": u(keys[8], (3, 1, H)),
    }

    input_seq = jax.random.randint(keys[9], (T, B), 0, V)        # (seq, batch) token ids
    input_lengths = jnp.array([8, 5], jnp.int32)                 # sorted descending

    outputs, hidden = encoder_rnn_forward(input_seq, input_lengths,
                                          emb_table, params, time_block=4)
    jax.block_until_ready((outputs, hidden))

    # correctness check against a pure-JAX reference of the same math
    x_emb = emb_table[input_seq].astype(jnp.float32)
    ref_out, ref_hid = ref_forward(x_emb, input_lengths, params)
    np.testing.assert_allclose(np.asarray(outputs), np.asarray(ref_out),
                               rtol=1e-2, atol=5e-3)
    np.testing.assert_allclose(np.asarray(hidden), np.asarray(ref_hid),
                               rtol=1e-2, atol=5e-3)

    assert outputs.shape == (T, B, H) and hidden.shape == (2, B, H)
    print("KERNEL_OK")
</pallas_src>

<mosaic_0001>
module attributes {stable_mosaic.version = 11 : i64} {
  func.func @_bigru_kernel(%arg0: i32, %arg1: i32, %arg2: memref<8x1xi32, #tpu.memory_space<vmem>>, %arg3: memref<4x8x384xbf16, #tpu.memory_space<vmem>>, %arg4: memref<4x8x384xbf16, #tpu.memory_space<vmem>>, %arg5: memref<128x384xbf16, #tpu.memory_space<vmem>>, %arg6: memref<1x384xf32, #tpu.memory_space<vmem>>, %arg7: memref<128x384xbf16, #tpu.memory_space<vmem>>, %arg8: memref<1x384xf32, #tpu.memory_space<vmem>>, %arg9: memref<4x8x128xf32, #tpu.memory_space<vmem>>, %arg10: memref<4x8x128xf32, #tpu.memory_space<vmem>>, %arg11: memref<2x8x128xf32, #tpu.memory_space<vmem>>, %arg12: memref<8x128xf32, #tpu.memory_space<vmem>>, %arg13: memref<8x128xf32, #tpu.memory_space<vmem>>) attributes {dimension_semantics = [#tpu.dimension_semantics<parallel>, #tpu.dimension_semantics<arbitrary>], iteration_bounds = array<i64: 1, 2>, scalar_prefetch = 0 : i64, scratch_operands = 2 : i64, tpu.core_type = #tpu.core_type<tc>, window_params = [{transform_indices = @transform_0, window_bounds = array<i64: 8, 1>}, {transform_indices = @transform_1, window_bounds = array<i64: 4, 8, 384>}, {transform_indices = @transform_2, window_bounds = array<i64: 4, 8, 384>}, {pipeline_mode = #tpu.pipeline_mode<synchronous>, transform_indices = @transform_3, window_bounds = array<i64: 128, 384>}, {pipeline_mode = #tpu.pipeline_mode<synchronous>, transform_indices = @transform_4, window_bounds = array<i64: 1, 384>}, {pipeline_mode = #tpu.pipeline_mode<synchronous>, transform_indices = @transform_5, window_bounds = array<i64: 128, 384>}, {pipeline_mode = #tpu.pipeline_mode<synchronous>, transform_indices = @transform_6, window_bounds = array<i64: 1, 384>}, {transform_indices = @transform_7, window_bounds = array<i64: 4, 8, 128>}, {transform_indices = @transform_8, window_bounds = array<i64: 4, 8, 128>}, {transform_indices = @transform_9, window_bounds = array<i64: 2, 8, 128>}]} {
    %c0 = arith.constant 0 : index
    %c0_0 = arith.constant 0 : index
    %0 = vector.load %arg2[%c0, %c0_0] : memref<8x1xi32, #tpu.memory_space<vmem>>, vector<8x1xi32>
    %c0_i32 = arith.constant 0 : i32
    %1 = arith.cmpi eq, %arg1, %c0_i32 : i32
    %2 = arith.extui %1 : i1 to i32
    %c0_i32_1 = arith.constant 0 : i32
    %3 = arith.cmpi ne, %2, %c0_i32_1 : i32
    scf.if %3 {
      %cst_107 = arith.constant 0.000000e+00 : f32
      %415 = vector.broadcast %cst_107 : f32 to vector<8x128xf32>
      %c0_108 = arith.constant 0 : index
      %c0_109 = arith.constant 0 : index
      %416 = vector.load %arg12[%c0_108, %c0_109] : memref<8x128xf32, #tpu.memory_space<vmem>>, vector<8x128xf32>
      tpu.vector_store %arg12[%c0_108, %c0_109], %415 {strides = array<i32>} : memref<8x128xf32, #tpu.memory_space<vmem>>, vector<8x128xf32>,
      %cst_110 = arith.constant 0.000000e+00 : f32
      %417 = vector.broadcast %cst_110 : f32 to vector<8x128xf32>
      %c0_111 = arith.constant 0 : index
      %c0_112 = arith.constant 0 : index
      %418 = vector.load %arg13[%c0_111, %c0_112] : memref<8x128xf32, #tpu.memory_space<vmem>>, vector<8x128xf32>
      tpu.vector_store %arg13[%c0_111, %c0_112], %417 {strides = array<i32>} : memref<8x128xf32, #tpu.memory_space<vmem>>, vector<8x128xf32>,
    } else {
    }
    %c0_2 = arith.constant 0 : index
    %c0_3 = arith.constant 0 : index
    %4 = vector.load %arg5[%c0_2, %c0_3] : memref<128x384xbf16, #tpu.memory_space<vmem>>, vector<128x384xbf16>
    %c0_4 = arith.constant 0 : index
    %c0_5 = arith.constant 0 : index
    %5 = vector.load %arg6[%c0_4, %c0_5] : memref<1x384xf32, #tpu.memory_space<vmem>>, vector<1x384xf32>
    %c0_6 = arith.constant 0 : index
    %c0_7 = arith.constant 0 : index
    %6 = vector.load %arg7[%c0_6, %c0_7] : memref<128x384xbf16, #tpu.memory_space<vmem>>, vector<128x384xbf16>
    %c0_8 = arith.constant 0 : index
    %c0_9 = arith.constant 0 : index
    %7 = vector.load %arg8[%c0_8, %c0_9] : memref<1x384xf32, #tpu.memory_space<vmem>>, vector<1x384xf32>
    %c0_10 = arith.constant 0 : index
    %c0_11 = arith.constant 0 : index
    %8 = vector.load %arg12[%c0_10, %c0_11] : memref<8x128xf32, #tpu.memory_space<vmem>>, vector<8x128xf32>
    %c0_12 = arith.constant 0 : index
    %c0_13 = arith.constant 0 : index
    %9 = vector.load %arg13[%c0_12, %c0_13] : memref<8x128xf32, #tpu.memory_space<vmem>>, vector<8x128xf32>
    %c0_i32_14 = arith.constant 0 : i32
    %c4_i32 = arith.constant 4 : i32
    %10 = arith.muli %arg1, %c4_i32 : i32
    %11 = arith.addi %10, %c0_i32_14 : i32
    %12 = arith.index_cast %c0_i32_14 : i32 to index
    %c0_15 = arith.constant 0 : index
    %c0_16 = arith.constant 0 : index
    %13 = vector.load %arg3[%12, %c0_15, %c0_16] : memref<4x8x384xbf16, #tpu.memory_space<vmem>>, vector<1x8x384xbf16>
    %14 = vector.shape_cast %13 : vector<1x8x384xbf16> to vector<8x384xbf16>
    %15 = arith.extf %14 : vector<8x384xbf16> to vector<8x384xf32>
    %16 = arith.truncf %8 : vector<8x128xf32> to vector<8x128xbf16>
    %cst = arith.constant dense<0.000000e+00> : vector<8x384xf32>
    %17 = tpu.matmul %16, %4, %cst {dimension_numbers = #tpu.dot_dimension_numbers<[1], [0], [0], [1], [0, 0, 1, 1], [], []>} : vector<8x128xbf16>, vector<128x384xbf16>, vector<8x384xf32> -> vector<8x384xf32>
    %18 = vector.broadcast %5 : vector<1x384xf32> to vector<8x384xf32>
    %19 = arith.addf %17, %18 : vector<8x384xf32>
    %20 = vector.extract_strided_slice %15 {offsets = [0, 0], sizes = [8, 128], strides = [1, 1]} : vector<8x384xf32> to vector<8x128xf32>
    %21 = vector.extract_strided_slice %19 {offsets = [0, 0], sizes = [8, 128], strides = [1, 1]} : vector<8x384xf32> to vector<8x128xf32>
    %22 = arith.addf %20, %21 : vector<8x128xf32>
    %23 = arith.negf %22 : vector<8x128xf32>
    %24 = math.exp %23 : vector<8x128xf32>
    %cst_17 = arith.constant 1.000000e+00 : f32
    %25 = vector.broadcast %cst_17 : f32 to vector<8x128xf32>
    %26 = arith.addf %25, %24 : vector<8x128xf32>
    %27 = arith.divf %25, %26 : vector<8x128xf32>
    %28 = vector.extract_strided_slice %15 {offsets = [0, 128], sizes = [8, 128], strides = [1, 1]} : vector<8x384xf32> to vector<8x128xf32>
    %29 = vector.extract_strided_slice %19 {offsets = [0, 128], sizes = [8, 128], strides = [1, 1]} : vector<8x384xf32> to vector<8x128xf32>
    %30 = arith.addf %28, %29 : vector<8x128xf32>
    %31 = arith.negf %30 : vector<8x128xf32>
    %32 = math.exp %31 : vector<8x128xf32>
    %cst_18 = arith.constant 1.000000e+00 : f32
    %33 = vector.broadcast %cst_18 : f32 to vector<8x128xf32>
    %34 = arith.addf %33, %32 : vector<8x128xf32>
    %35 = arith.divf %33, %34 : vector<8x128xf32>
    %36 = vector.extract_strided_slice %15 {offsets = [0, 256], sizes = [8, 128], strides = [1, 1]} : vector<8x384xf32> to vector<8x128xf32>
    %37 = vector.extract_strided_slice %19 {offsets = [0, 256], sizes = [8, 128], strides = [1, 1]} : vector<8x384xf32> to vector<8x128xf32>
    %38 = arith.mulf %27, %37 : vector<8x128xf32>
    %39 = arith.addf %36, %38 : vector<8x128xf32>
    %40 = math.tanh %39 : vector<8x128xf32>
    %cst_19 = arith.constant 1.000000e+00 : f32
    %41 = vector.broadcast %cst_19 : f32 to vector<8x128xf32>
    %42 = arith.subf %41, %35 : vector<8x128xf32>
    %43 = arith.mulf %42, %40 : vector<8x128xf32>
    %44 = arith.mulf %35, %8 : vector<8x128xf32>
    %45 = arith.addf %43, %44 : vector<8x128xf32>
    %46 = vector.broadcast %11 : i32 to vector<8x1xi32>
    %47 = arith.cmpi slt, %46, %0 : vector<8x1xi32>
    %48 = vector.shape_cast %47 : vector<8x1xi1> to vector<8x1xi1>
    %49 = vector.broadcast %48 : vector<8x1xi1> to vector<8x128xi1>
    %50 = arith.select %49, %45, %8 : vector<8x128xi1>, vector<8x128xf32>
    %cst_20 = arith.constant 0.000000e+00 : f32
    %51 = vector.shape_cast %47 : vector<8x1xi1> to vector<8x1xi1>
    %52 = vector.broadcast %51 : vector<8x1xi1> to vector<8x128xi1>
    %53 = vector.broadcast %cst_20 : f32 to vector<8x128xf32>
    %54 = arith.select %52, %50, %53 : vector<8x128xi1>, vector<8x128xf32>
    %55 = arith.index_cast %c0_i32_14 : i32 to index
    %c0_21 = arith.constant 0 : index
    %c0_22 = arith.constant 0 : index
    %56 = vector.load %arg9[%55, %c0_21, %c0_22] : memref<4x8x128xf32, #tpu.memory_space<vmem>>, vector<1x8x128xf32>
    %57 = vector.shape_cast %56 : vector<1x8x128xf32> to vector<8x128xf32>
    %58 = vector.shape_cast %54 : vector<8x128xf32> to vector<1x8x128xf32>
    tpu.vector_store %arg9[%55, %c0_21, %c0_22], %58 {strides = array<i32>} : memref<4x8x128xf32, #tpu.memory_space<vmem>>, vector<1x8x128xf32>,
    %c3_i32 = arith.constant 3 : i32
    %59 = arith.subi %c3_i32, %c0_i32_14 : i32
    %c4_i32_23 = arith.constant 4 : i32
    %60 = arith.muli %arg1, %c4_i32_23 : i32
    %61 = arith.addi %60, %c0_i32_14 : i32
    %c7_i32 = arith.constant 7 : i32
    %62 = arith.subi %c7_i32, %61 : i32
    %63 = arith.index_cast %59 : i32 to index
    %c0_24 = arith.constant 0 : index
    %c0_25 = arith.constant 0 : index
    %64 = vector.load %arg4[%63, %c0_24, %c0_25] : memref<4x8x384xbf16, #tpu.memory_space<vmem>>, vector<1x8x384xbf16>
    %65 = vector.shape_cast %64 : vector<1x8x384xbf16> to vector<8x384xbf16>
    %66 = arith.extf %65 : vector<8x384xbf16> to vector<8x384xf32>
    %67 = arith.truncf %9 : vector<8x128xf32> to vector<8x128xbf16>
    %cst_26 = arith.constant dense<0.000000e+00> : vector<8x384xf32>
    %68 = tpu.matmul %67, %6, %cst_26 {dimension_numbers = #tpu.dot_dimension_numbers<[1], [0], [0], [1], [0, 0, 1, 1], [], []>} : vector<8x128xbf16>, vector<128x384xbf16>, vector<8x384xf32> -> vector<8x384xf32>
    %69 = vector.broadcast %7 : vector<1x384xf32> to vector<8x384xf32>
    %70 = arith.addf %68, %69 : vector<8x384xf32>
    %71 = vector.extract_strided_slice %66 {offsets = [0, 0], sizes = [8, 128], strides = [1, 1]} : vector<8x384xf32> to vector<8x128xf32>
    %72 = vector.extract_strided_slice %70 {offsets = [0, 0], sizes = [8, 128], strides = [1, 1]} : vector<8x384xf32> to vector<8x128xf32>
    %73 = arith.addf %71, %72 : vector<8x128xf32>
    %74 = arith.negf %73 : vector<8x128xf32>
    %75 = math.exp %74 : vector<8x128xf32>
    %cst_27 = arith.constant 1.000000e+00 : f32
    %76 = vector.broadcast %cst_27 : f32 to vector<8x128xf32>
    %77 = arith.addf %76, %75 : vector<8x128xf32>
    %78 = arith.divf %76, %77 : vector<8x128xf32>
    %79 = vector.extract_strided_slice %66 {offsets = [0, 128], sizes = [8, 128], strides = [1, 1]} : vector<8x384xf32> to vector<8x128xf32>
    %80 = vector.extract_strided_slice %70 {offsets = [0, 128], sizes = [8, 128], strides = [1, 1]} : vector<8x384xf32> to vector<8x128xf32>
    %81 = arith.addf %79, %80 : vector<8x128xf32>
    %82 = arith.negf %81 : vector<8x128xf32>
    %83 = math.exp %82 : vector<8x128xf32>
    %cst_28 = arith.constant 1.000000e+00 : f32
    %84 = vector.broadcast %cst_28 : f32 to vector<8x128xf32>
    %85 = arith.addf %84, %83 : vector<8x128xf32>
    %86 = arith.divf %84, %85 : vector<8x128xf32>
    %87 = vector.extract_strided_slice %66 {offsets = [0, 256], sizes = [8, 128], strides = [1, 1]} : vector<8x384xf32> to vector<8x128xf32>
    %88 = vector.extract_strided_slice %70 {offsets = [0, 256], sizes = [8, 128], strides = [1, 1]} : vector<8x384xf32> to vector<8x128xf32>
    %89 = arith.mulf %78, %88 : vector<8x128xf32>
    %90 = arith.addf %87, %89 : vector<8x128xf32>
    %91 = math.tanh %90 : vector<8x128xf32>
    %cst_29 = arith.constant 1.000000e+00 : f32
    %92 = vector.broadcast %cst_29 : f32 to vector<8x128xf32>
    %93 = arith.subf %92, %86 : vector<8x128xf32>
    %94 = arith.mulf %93, %91 : vector<8x128xf32>
    %95 = arith.mulf %86, %9 : vector<8x128xf32>
    %96 = arith.addf %94, %95 : vector<8x128xf32>
    %97 = vector.broadcast %62 : i32 to vector<8x1xi32>
    %98 = arith.cmpi slt, %97, %0 : vector<8x1xi32>
    %99 = vector.shape_cast %98 : vector<8x1xi1> to vector<8x1xi1>
    %100 = vector.broadcast %99 : vector<8x1xi1> to vector<8x128xi1>
    %101 = arith.select %100, %96, %9 : vector<8x128xi1>, vector<8x128xf32>
    %cst_30 = arith.constant 0.000000e+00 : f32
    %102 = vector.shape_cast %98 : vector<8x1xi1> to vector<8x1xi1>
    %103 = vector.broadcast %102 : vector<8x1xi1> to vector<8x128xi1>
    %104 = vector.broadcast %cst_30 : f32 to vector<8x128xf32>
    %105 = arith.select %103, %101, %104 : vector<8x128xi1>, vector<8x128xf32>
    %106 = arith.index_cast %59 : i32 to index
    %c0_31 = arith.constant 0 : index
    %c0_32 = arith.constant 0 : index
    %107 = vector.load %arg10[%106, %c0_31, %c0_32] : memref<4x8x128xf32, #tpu.memory_space<vmem>>, vector<1x8x128xf32>
    %108 = vector.shape_cast %107 : vector<1x8x128xf32> to vector<8x128xf32>
    %109 = vector.shape_cast %105 : vector<8x128xf32> to vector<1x8x128xf32>
    tpu.vector_store %arg10[%106, %c0_31, %c0_32], %109 {strides = array<i32>} : memref<4x8x128xf32, #tpu.memory_space<vmem>>, vector<1x8x128xf32>,
    %c1_i32 = arith.constant 1 : i32
    %c4_i32_33 = arith.constant 4 : i32
    %110 = arith.muli %arg1, %c4_i32_33 : i32
    %111 = arith.addi %110, %c1_i32 : i32
    %112 = arith.index_cast %c1_i32 : i32 to index
    %c0_34 = arith.constant 0 : index
    %c0_35 = arith.constant 0 : index
    %113 = vector.load %arg3[%112, %c0_34, %c0_35] : memref<4x8x384xbf16, #tpu.memory_space<vmem>>, vector<1x8x384xbf16>
    %114 = vector.shape_cast %113 : vector<1x8x384xbf16> to vector<8x384xbf16>
    %115 = arith.extf %114 : vector<8x384xbf16> to vector<8x384xf32>
    %116 = arith.truncf %50 : vector<8x128xf32> to vector<8x128xbf16>
    %cst_36 = arith.constant dense<0.000000e+00> : vector<8x384xf32>
    %117 = tpu.matmul %116, %4, %cst_36 {dimension_numbers = #tpu.dot_dimension_numbers<[1], [0], [0], [1], [0, 0, 1, 1], [], []>} : vector<8x128xbf16>, vector<128x384xbf16>, vector<8x384xf32> -> vector<8x384xf32>
    %118 = vector.broadcast %5 : vector<1x384xf32> to vector<8x384xf32>
    %119 = arith.addf %117, %118 : vector<8x384xf32>
    %120 = vector.extract_strided_slice %115 {offsets = [0, 0], sizes = [8, 128], strides = [1, 1]} : vector<8x384xf32> to vector<8x128xf32>
    %121 = vector.extract_strided_slice %119 {offsets = [0, 0], sizes = [8, 128], strides = [1, 1]} : vector<8x384xf32> to vector<8x128xf32>
    %122 = arith.addf %120, %121 : vector<8x128xf32>
    %123 = arith.negf %122 : vector<8x128xf32>
    %124 = math.exp %123 : vector<8x128xf32>
    %cst_37 = arith.constant 1.000000e+00 : f32
    %125 = vector.broadcast %cst_37 : f32 to vector<8x128xf32>
    %126 = arith.addf %125, %124 : vector<8x128xf32>
    %127 = arith.divf %125, %126 : vector<8x128xf32>
    %128 = vector.extract_strided_slice %115 {offsets = [0, 128], sizes = [8, 128], strides = [1, 1]} : vector<8x384xf32> to vector<8x128xf32>
    %129 = vector.extract_strided_slice %119 {offsets = [0, 128], sizes = [8, 128], strides = [1, 1]} : vector<8x384xf32> to vector<8x128xf32>
    %130 = arith.addf %128, %129 : vector<8x128xf32>
    %131 = arith.negf %130 : vector<8x128xf32>
    %132 = math.exp %131 : vector<8x128xf32>
    %cst_38 = arith.constant 1.000000e+00 : f32
    %133 = vector.broadcast %cst_38 : f32 to vector<8x128xf32>
    %134 = arith.addf %133, %132 : vector<8x128xf32>
    %135 = arith.divf %133, %134 : vector<8x128xf32>
    %136 = vector.extract_strided_slice %115 {offsets = [0, 256], sizes = [8, 128], strides = [1, 1]} : vector<8x384xf32> to vector<8x128xf32>
    %137 = vector.extract_strided_slice %119 {offsets = [0, 256], sizes = [8, 128], strides = [1, 1]} : vector<8x384xf32> to vector<8x128xf32>
    %138 = arith.mulf %127, %137 : vector<8x128xf32>
    %139 = arith.addf %136, %138 : vector<8x128xf32>
    %140 = math.tanh %139 : vector<8x128xf32>
    %cst_39 = arith.constant 1.000000e+00 : f32
    %141 = vector.broadcast %cst_39 : f32 to vector<8x128xf32>
    %142 = arith.subf %141, %135 : vector<8x128xf32>
    %143 = arith.mulf %142, %140 : vector<8x128xf32>
    %144 = arith.mulf %135, %50 : vector<8x128xf32>
    %145 = arith.addf %143, %144 : vector<8x128xf32>
    %146 = vector.broadcast %111 : i32 to vector<8x1xi32>
    %147 = arith.cmpi slt, %146, %0 : vector<8x1xi32>
    %148 = vector.shape_cast %147 : vector<8x1xi1> to vector<8x1xi1>
    %149 = vector.broadcast %148 : vector<8x1xi1> to vector<8x128xi1>
    %150 = arith.select %149, %145, %50 : vector<8x128xi1>, vector<8x128xf32>
    %cst_40 = arith.constant 0.000000e+00 : f32
    %151 = vector.shape_cast %147 : vector<8x1xi1> to vector<8x1xi1>
    %152 = vector.broadcast %151 : vector<8x1xi1> to vector<8x128xi1>
    %153 = vector.broadcast %cst_40 : f32 to vector<8x128xf32>
    %154 = arith.select %152, %150, %153 : vector<8x128xi1>, vector<8x128xf32>
    %155 = arith.index_cast %c1_i32 : i32 to index
    %c0_41 = arith.constant 0 : index
    %c0_42 = arith.constant 0 : index
    %156 = vector.load %arg9[%155, %c0_41, %c0_42] : memref<4x8x128xf32, #tpu.memory_space<vmem>>, vector<1x8x128xf32>
    %157 = vector.shape_cast %156 : vector<1x8x128xf32> to vector<8x128xf32>
    %158 = vector.shape_cast %154 : vector<8x128xf32> to vector<1x8x128xf32>
    tpu.vector_store %arg9[%155, %c0_41, %c0_42], %158 {strides = array<i32>} : memref<4x8x128xf32, #tpu.memory_space<vmem>>, vector<1x8x128xf32>,
    %c3_i32_43 = arith.constant 3 : i32
    %159 = arith.subi %c3_i32_43, %c1_i32 : i32
    %c4_i32_44 = arith.constant 4 : i32
    %160 = arith.muli %arg1, %c4_i32_44 : i32
    %161 = arith.addi %160, %c1_i32 : i32
    %c7_i32_45 = arith.constant 7 : i32
    %162 = arith.subi %c7_i32_45, %161 : i32
    %163 = arith.index_cast %159 : i32 to index
    %c0_46 = arith.constant 0 : index
    %c0_47 = arith.constant 0 : index
    %164 = vector.load %arg4[%163, %c0_46, %c0_47] : memref<4x8x384xbf16, #tpu.memory_space<vmem>>, vector<1x8x384xbf16>
    %165 = vector.shape_cast %164 : vector<1x8x384xbf16> to vector<8x384xbf16>
    %166 = arith.extf %165 : vector<8x384xbf16> to vector<8x384xf32>
    %167 = arith.truncf %101 : vector<8x128xf32> to vector<8x128xbf16>
    %cst_48 = arith.constant dense<0.000000e+00> : vector<8x384xf32>
    %168 = tpu.matmul %167, %6, %cst_48 {dimension_numbers = #tpu.dot_dimension_numbers<[1], [0], [0], [1], [0, 0, 1, 1], [], []>} : vector<8x128xbf16>, vector<128x384xbf16>, vector<8x384xf32> -> vector<8x384xf32>
    %169 = vector.broadcast %7 : vector<1x384xf32> to vector<8x384xf32>
    %170 = arith.addf %168, %169 : vector<8x384xf32>
    %171 = vector.extract_strided_slice %166 {offsets = [0, 0], sizes = [8, 128], strides = [1, 1]} : vector<8x384xf32> to vector<8x128xf32>
    %172 = vector.extract_strided_slice %170 {offsets = [0, 0], sizes = [8, 128], strides = [1, 1]} : vector<8x384xf32> to vector<8x128xf32>
    %173 = arith.addf %171, %172 : vector<8x128xf32>
    %174 = arith.negf %173 : vector<8x128xf32>
    %175 = math.exp %174 : vector<8x128xf32>
    %cst_49 = arith.constant 1.000000e+00 : f32
    %176 = vector.broadcast %cst_49 : f32 to vector<8x128xf32>
    %177 = arith.addf %176, %175 : vector<8x128xf32>
    %178 = arith.divf %176, %177 : vector<8x128xf32>
    %179 = vector.extract_strided_slice %166 {offsets = [0, 128], sizes = [8, 128], strides = [1, 1]} : vector<8x384xf32> to vector<8x128xf32>
    %180 = vector.extract_strided_slice %170 {offsets = [0, 128], sizes = [8, 128], strides = [1, 1]} : vector<8x384xf32> to vector<8x128xf32>
    %181 = arith.addf %179, %180 : vector<8x128xf32>
    %182 = arith.negf %181 : vector<8x128xf32>
    %183 = math.exp %182 : vector<8x128xf32>
    %cst_50 = arith.constant 1.000000e+00 : f32
    %184 = vector.broadcast %cst_50 : f32 to vector<8x128xf32>
    %185 = arith.addf %184, %183 : vector<8x128xf32>
    %186 = arith.divf %184, %185 : vector<8x128xf32>
    %187 = vector.extract_strided_slice %166 {offsets = [0, 256], sizes = [8, 128], strides = [1, 1]} : vector<8x384xf32> to vector<8x128xf32>
    %188 = vector.extract_strided_slice %170 {offsets = [0, 256], sizes = [8, 128], strides = [1, 1]} : vector<8x384xf32> to vector<8x128xf32>
    %189 = arith.mulf %178, %188 : vector<8x128xf32>
    %190 = arith.addf %187, %189 : vector<8x128xf32>
    %191 = math.tanh %190 : vector<8x128xf32>
    %cst_51 = arith.constant 1.000000e+00 : f32
    %192 = vector.broadcast %cst_51 : f32 to vector<8x128xf32>
    %193 = arith.subf %192, %186 : vector<8x128xf32>
    %194 = arith.mulf %193, %191 : vector<8x128xf32>
    %195 = arith.mulf %186, %101 : vector<8x128xf32>
    %196 = arith.addf %194, %195 : vector<8x128xf32>
    %197 = vector.broadcast %162 : i32 to vector<8x1xi32>
    %198 = arith.cmpi slt, %197, %0 : vector<8x1xi32>
    %199 = vector.shape_cast %198 : vector<8x1xi1> to vector<8x1xi1>
    %200 = vector.broadcast %199 : vector<8x1xi1> to vector<8x128xi1>
    %201 = arith.select %200, %196, %101 : vector<8x128xi1>, vector<8x128xf32>
    %cst_52 = arith.constant 0.000000e+00 : f32
    %202 = vector.shape_cast %198 : vector<8x1xi1> to vector<8x1xi1>
    %203 = vector.broadcast %202 : vector<8x1xi1> to vector<8x128xi1>
    %204 = vector.broadcast %cst_52 : f32 to vector<8x128xf32>
    %205 = arith.select %203, %201, %204 : vector<8x128xi1>, vector<8x128xf32>
    %206 = arith.index_cast %159 : i32 to index
    %c0_53 = arith.constant 0 : index
    %c0_54 = arith.constant 0 : index
    %207 = vector.load %arg10[%206, %c0_53, %c0_54] : memref<4x8x128xf32, #tpu.memory_space<vmem>>, vector<1x8x128xf32>
    %208 = vector.shape_cast %207 : vector<1x8x128xf32> to vector<8x128xf32>
    %209 = vector.shape_cast %205 : vector<8x128xf32> to vector<1x8x128xf32>
    tpu.vector_store %arg10[%206, %c0_53, %c0_54], %209 {strides = array<i32>} : memref<4x8x128xf32, #tpu.memory_space<vmem>>, vector<1x8x128xf32>,
    %c2_i32 = arith.constant 2 : i32
    %c4_i32_55 = arith.constant 4 : i32
    %210 = arith.muli %arg1, %c4_i32_55 : i32
    %211 = arith.addi %210, %c2_i32 : i32
    %212 = arith.index_cast %c2_i32 : i32 to index
    %c0_56 = arith.constant 0 : index
    %c0_57 = arith.constant 0 : index
    %213 = vector.load %arg3[%212, %c0_56, %c0_57] : memref<4x8x384xbf16, #tpu.memory_space<vmem>>, vector<1x8x384xbf16>
    %214 = vector.shape_cast %213 : vector<1x8x384xbf16> to vector<8x384xbf16>
    %215 = arith.extf %214 : vector<8x384xbf16> to vector<8x384xf32>
    %216 = arith.truncf %150 : vector<8x128xf32> to vector<8x128xbf16>
    %cst_58 = arith.constant dense<0.000000e+00> : vector<8x384xf32>
    %217 = tpu.matmul %216, %4, %cst_58 {dimension_numbers = #tpu.dot_dimension_numbers<[1], [0], [0], [1], [0, 0, 1, 1], [], []>} : vector<8x128xbf16>, vector<128x384xbf16>, vector<8x384xf32> -> vector<8x384xf32>
    %218 = vector.broadcast %5 : vector<1x384xf32> to vector<8x384xf32>
    %219 = arith.addf %217, %218 : vector<8x384xf32>
    %220 = vector.extract_strided_slice %215 {offsets = [0, 0], sizes = [8, 128], strides = [1, 1]} : vector<8x384xf32> to vector<8x128xf32>
    %221 = vector.extract_strided_slice %219 {offsets = [0, 0], sizes = [8, 128], strides = [1, 1]} : vector<8x384xf32> to vector<8x128xf32>
    %222 = arith.addf %220, %221 : vector<8x128xf32>
    %223 = arith.negf %222 : vector<8x128xf32>
    %224 = math.exp %223 : vector<8x128xf32>
    %cst_59 = arith.constant 1.000000e+00 : f32
    %225 = vector.broadcast %cst_59 : f32 to vector<8x128xf32>
    %226 = arith.addf %225, %224 : vector<8x128xf32>
    %227 = arith.divf %225, %226 : vector<8x128xf32>
    %228 = vector.extract_strided_slice %215 {offsets = [0, 128], sizes = [8, 128], strides = [1, 1]} : vector<8x384xf32> to vector<8x128xf32>
    %229 = vector.extract_strided_slice %219 {offsets = [0, 128], sizes = [8, 128], strides = [1, 1]} : vector<8x384xf32> to vector<8x128xf32>
    %230 = arith.addf %228, %229 : vector<8x128xf32>
    %231 = arith.negf %230 : vector<8x128xf32>
    %232 = math.exp %231 : vector<8x128xf32>
    %cst_60 = arith.constant 1.000000e+00 : f32
    %233 = vector.broadcast %cst_60 : f32 to vector<8x128xf32>
    %234 = arith.addf %233, %232 : vector<8x128xf32>
    %235 = arith.divf %233, %234 : vector<8x128xf32>
    %236 = vector.extract_strided_slice %215 {offsets = [0, 256], sizes = [8, 128], strides = [1, 1]} : vector<8x384xf32> to vector<8x128xf32>
    %237 = vector.extract_strided_slice %219 {offsets = [0, 256], sizes = [8, 128], strides = [1, 1]} : vector<8x384xf32> to vector<8x128xf32>
    %238 = arith.mulf %227, %237 : vector<8x128xf32>
    %239 = arith.addf %236, %238 : vector<8x128xf32>
    %240 = math.tanh %239 : vector<8x128xf32>
    %cst_61 = arith.constant 1.000000e+00 : f32
    %241 = vector.broadcast %cst_61 : f32 to vector<8x128xf32>
    %242 = arith.subf %241, %235 : vector<8x128xf32>
    %243 = arith.mulf %242, %240 : vector<8x128xf32>
    %244 = arith.mulf %235, %150 : vector<8x128xf32>
    %245 = arith.addf %243, %244 : vector<8x128xf32>
    %246 = vector.broadcast %211 : i32 to vector<8x1xi32>
    %247 = arith.cmpi slt, %246, %0 : vector<8x1xi32>
    %248 = vector.shape_cast %247 : vector<8x1xi1> to vector<8x1xi1>
    %249 = vector.broadcast %248 : vector<8x1xi1> to vector<8x128xi1>
    %250 = arith.select %249, %245, %150 : vector<8x128xi1>, vector<8x128xf32>
    %cst_62 = arith.constant 0.000000e+00 : f32
    %251 = vector.shape_cast %247 : vector<8x1xi1> to vector<8x1xi1>
    %252 = vector.broadcast %251 : vector<8x1xi1> to vector<8x128xi1>
    %253 = vector.broadcast %cst_62 : f32 to vector<8x128xf32>
    %254 = arith.select %252, %250, %253 : vector<8x128xi1>, vector<8x128xf32>
    %255 = arith.index_cast %c2_i32 : i32 to index
    %c0_63 = arith.constant 0 : index
    %c0_64 = arith.constant 0 : index
    %256 = vector.load %arg9[%255, %c0_63, %c0_64] : memref<4x8x128xf32, #tpu.memory_space<vmem>>, vector<1x8x128xf32>
    %257 = vector.shape_cast %256 : vector<1x8x128xf32> to vector<8x128xf32>
    %258 = vector.shape_cast %254 : vector<8x128xf32> to vector<1x8x128xf32>
    tpu.vector_store %arg9[%255, %c0_63, %c0_64], %258 {strides = array<i32>} : memref<4x8x128xf32, #tpu.memory_space<vmem>>, vector<1x8x128xf32>,
    %c3_i32_65 = arith.constant 3 : i32
    %259 = arith.subi %c3_i32_65, %c2_i32 : i32
    %c4_i32_66 = arith.constant 4 : i32
    %260 = arith.muli %arg1, %c4_i32_66 : i32
    %261 = arith.addi %260, %c2_i32 : i32
    %c7_i32_67 = arith.constant 7 : i32
    %262 = arith.subi %c7_i32_67, %261 : i32
    %263 = arith.index_cast %259 : i32 to index
    %c0_68 = arith.constant 0 : index
    %c0_69 = arith.constant 0 : index
    %264 = vector.load %arg4[%263, %c0_68, %c0_69] : memref<4x8x384xbf16, #tpu.memory_space<vmem>>, vector<1x8x384xbf16>
    %265 = vector.shape_cast %264 : vector<1x8x384xbf16> to vector<8x384xbf16>
    %266 = arith.extf %265 : vector<8x384xbf16> to vector<8x384xf32>
    %267 = arith.truncf %201 : vector<8x128xf32> to vector<8x128xbf16>
    %cst_70 = arith.constant dense<0.000000e+00> : vector<8x384xf32>
    %268 = tpu.matmul %267, %6, %cst_70 {dimension_numbers = #tpu.dot_dimension_numbers<[1], [0], [0], [1], [0, 0, 1, 1], [], []>} : vector<8x128xbf16>, vector<128x384xbf16>, vector<8x384xf32> -> vector<8x384xf32>
    %269 = vector.broadcast %7 : vector<1x384xf32> to vector<8x384xf32>
    %270 = arith.addf %268, %269 : vector<8x384xf32>
    %271 = vector.extract_strided_slice %266 {offsets = [0, 0], sizes = [8, 128], strides = [1, 1]} : vector<8x384xf32> to vector<8x128xf32>
    %272 = vector.extract_strided_slice %270 {offsets = [0, 0], sizes = [8, 128], strides = [1, 1]} : vector<8x384xf32> to vector<8x128xf32>
    %273 = arith.addf %271, %272 : vector<8x128xf32>
    %274 = arith.negf %273 : vector<8x128xf32>
    %275 = math.exp %274 : vector<8x128xf32>
    %cst_71 = arith.constant 1.000000e+00 : f32
    %276 = vector.broadcast %cst_71 : f32 to vector<8x128xf32>
    %277 = arith.addf %276, %275 : vector<8x128xf32>
    %278 = arith.divf %276, %277 : vector<8x128xf32>
    %279 = vector.extract_strided_slice %266 {offsets = [0, 128], sizes = [8, 128], strides = [1, 1]} : vector<8x384xf32> to vector<8x128xf32>
    %280 = vector.extract_strided_slice %270 {offsets = [0, 128], sizes = [8, 128], strides = [1, 1]} : vector<8x384xf32> to vector<8x128xf32>
    %281 = arith.addf %279, %280 : vector<8x128xf32>
    %282 = arith.negf %281 : vector<8x128xf32>
    %283 = math.exp %282 : vector<8x128xf32>
    %cst_72 = arith.constant 1.000000e+00 : f32
    %284 = vector.broadcast %cst_72 : f32 to vector<8x128xf32>
    %285 = arith.addf %284, %283 : vector<8x128xf32>
    %286 = arith.divf %284, %285 : vector<8x128xf32>
    %287 = vector.extract_strided_slice %266 {offsets = [0, 256], sizes = [8, 128], strides = [1, 1]} : vector<8x384xf32> to vector<8x128xf32>
    %288 = vector.extract_strided_slice %270 {offsets = [0, 256], sizes = [8, 128], strides = [1, 1]} : vector<8x384xf32> to vector<8x128xf32>
    %289 = arith.mulf %278, %288 : vector<8x128xf32>
    %290 = arith.addf %287, %289 : vector<8x128xf32>
    %291 = math.tanh %290 : vector<8x128xf32>
    %cst_73 = arith.constant 1.000000e+00 : f32
    %292 = vector.broadcast %cst_73 : f32 to vector<8x128xf32>
    %293 = arith.subf %292, %286 : vector<8x128xf32>
    %294 = arith.mulf %293, %291 : vector<8x128xf32>
    %295 = arith.mulf %286, %201 : vector<8x128xf32>
    %296 = arith.addf %294, %295 : vector<8x128xf32>
    %297 = vector.broadcast %262 : i32 to vector<8x1xi32>
    %298 = arith.cmpi slt, %297, %0 : vector<8x1xi32>
    %299 = vector.shape_cast %298 : vector<8x1xi1> to vector<8x1xi1>
    %300 = vector.broadcast %299 : vector<8x1xi1> to vector<8x128xi1>
    %301 = arith.select %300, %296, %201 : vector<8x128xi1>, vector<8x128xf32>
    %cst_74 = arith.constant 0.000000e+00 : f32
    %302 = vector.shape_cast %298 : vector<8x1xi1> to vector<8x1xi1>
    %303 = vector.broadcast %302 : vector<8x1xi1> to vector<8x128xi1>
    %304 = vector.broadcast %cst_74 : f32 to vector<8x128xf32>
    %305 = arith.select %303, %301, %304 : vector<8x128xi1>, vector<8x128xf32>
    %306 = arith.index_cast %259 : i32 to index
    %c0_75 = arith.constant 0 : index
    %c0_76 = arith.constant 0 : index
    %307 = vector.load %arg10[%306, %c0_75, %c0_76] : memref<4x8x128xf32, #tpu.memory_space<vmem>>, vector<1x8x128xf32>
    %308 = vector.shape_cast %307 : vector<1x8x128xf32> to vector<8x128xf32>
    %309 = vector.shape_cast %305 : vector<8x128xf32> to vector<1x8x128xf32>
    tpu.vector_store %arg10[%306, %c0_75, %c0_76], %309 {strides = array<i32>} : memref<4x8x128xf32, #tpu.memory_space<vmem>>, vector<1x8x128xf32>,
    %c3_i32_77 = arith.constant 3 : i32
    %c4_i32_78 = arith.constant 4 : i32
    %310 = arith.muli %arg1, %c4_i32_78 : i32
    %311 = arith.addi %310, %c3_i32_77 : i32
    %312 = arith.index_cast %c3_i32_77 : i32 to index
    %c0_79 = arith.constant 0 : index
    %c0_80 = arith.constant 0 : index
    %313 = vector.load %arg3[%312, %c0_79, %c0_80] : memref<4x8x384xbf16, #tpu.memory_space<vmem>>, vector<1x8x384xbf16>
    %314 = vector.shape_cast %313 : vector<1x8x384xbf16> to vector<8x384xbf16>
    %315 = arith.extf %314 : vector<8x384xbf16> to vector<8x384xf32>
    %316 = arith.truncf %250 : vector<8x128xf32> to vector<8x128xbf16>
    %cst_81 = arith.constant dense<0.000000e+00> : vector<8x384xf32>
    %317 = tpu.matmul %316, %4, %cst_81 {dimension_numbers = #tpu.dot_dimension_numbers<[1], [0], [0], [1], [0, 0, 1, 1], [], []>} : vector<8x128xbf16>, vector<128x384xbf16>, vector<8x384xf32> -> vector<8x384xf32>
    %318 = vector.broadcast %5 : vector<1x384xf32> to vector<8x384xf32>
    %319 = arith.addf %317, %318 : vector<8x384xf32>
    %320 = vector.extract_strided_slice %315 {offsets = [0, 0], sizes = [8, 128], strides = [1, 1]} : vector<8x384xf32> to vector<8x128xf32>
    %321 = vector.extract_strided_slice %319 {offsets = [0, 0], sizes = [8, 128], strides = [1, 1]} : vector<8x384xf32> to vector<8x128xf32>
    %322 = arith.addf %320, %321 : vector<8x128xf32>
    %323 = arith.negf %322 : vector<8x128xf32>
    %324 = math.exp %323 : vector<8x128xf32>
    %cst_82 = arith.constant 1.000000e+00 : f32
    %325 = vector.broadcast %cst_82 : f32 to vector<8x128xf32>
    %326 = arith.addf %325, %324 : vector<8x128xf32>
    %327 = arith.divf %325, %326 : vector<8x128xf32>
    %328 = vector.extract_strided_slice %315 {offsets = [0, 128], sizes = [8, 128], strides = [1, 1]} : vector<8x384xf32> to vector<8x128xf32>
    %329 = vector.extract_strided_slice %319 {offsets = [0, 128], sizes = [8, 128], strides = [1, 1]} : vector<8x384xf32> to vector<8x128xf32>
    %330 = arith.addf %328, %329 : vector<8x128xf32>
    %331 = arith.negf %330 : vector<8x128xf32>
    %332 = math.exp %331 : vector<8x128xf32>
    %cst_83 = arith.constant 1.000000e+00 : f32
    %333 = vector.broadcast %cst_83 : f32 to vector<8x128xf32>
    %334 = arith.addf %333, %332 : vector<8x128xf32>
    %335 = arith.divf %333, %334 : vector<8x128xf32>
    %336 = vector.extract_strided_slice %315 {offsets = [0, 256], sizes = [8, 128], strides = [1, 1]} : vector<8x384xf32> to vector<8x128xf32>
    %337 = vector.extract_strided_slice %319 {offsets = [0, 256], sizes = [8, 128], strides = [1, 1]} : vector<8x384xf32> to vector<8x128xf32>
    %338 = arith.mulf %327, %337 : vector<8x128xf32>
    %339 = arith.addf %336, %338 : vector<8x128xf32>
    %340 = math.tanh %339 : vector<8x128xf32>
    %cst_84 = arith.constant 1.000000e+00 : f32
    %341 = vector.broadcast %cst_84 : f32 to vector<8x128xf32>
    %342 = arith.subf %341, %335 : vector<8x128xf32>
    %343 = arith.mulf %342, %340 : vector<8x128xf32>
    %344 = arith.mulf %335, %250 : vector<8x128xf32>
    %345 = arith.addf %343, %344 : vector<8x128xf32>
    %346 = vector.broadcast %311 : i32 to vector<8x1xi32>
    %347 = arith.cmpi slt, %346, %0 : vector<8x1xi32>
    %348 = vector.shape_cast %347 : vector<8x1xi1> to vector<8x1xi1>
    %349 = vector.broadcast %348 : vector<8x1xi1> to vector<8x128xi1>
    %350 = arith.select %349, %345, %250 : vector<8x128xi1>, vector<8x128xf32>
    %cst_85 = arith.constant 0.000000e+00 : f32
    %351 = vector.shape_cast %347 : vector<8x1xi1> to vector<8x1xi1>
    %352 = vector.broadcast %351 : vector<8x1xi1> to vector<8x128xi1>
    %353 = vector.broadcast %cst_85 : f32 to vector<8x128xf32>
    %354 = arith.select %352, %350, %353 : vector<8x128xi1>, vector<8x128xf32>
    %355 = arith.index_cast %c3_i32_77 : i32 to index
    %c0_86 = arith.constant 0 : index
    %c0_87 = arith.constant 0 : index
    %356 = vector.load %arg9[%355, %c0_86, %c0_87] : memref<4x8x128xf32, #tpu.memory_space<vmem>>, vector<1x8x128xf32>
    %357 = vector.shape_cast %356 : vector<1x8x128xf32> to vector<8x128xf32>
    %358 = vector.shape_cast %354 : vector<8x128xf32> to vector<1x8x128xf32>
    tpu.vector_store %arg9[%355, %c0_86, %c0_87], %358 {strides = array<i32>} : memref<4x8x128xf32, #tpu.memory_space<vmem>>, vector<1x8x128xf32>,
    %c3_i32_88 = arith.constant 3 : i32
    %359 = arith.subi %c3_i32_88, %c3_i32_77 : i32
    %c4_i32_89 = arith.constant 4 : i32
    %360 = arith.muli %arg1, %c4_i32_89 : i32
    %361 = arith.addi %360, %c3_i32_77 : i32
    %c7_i32_90 = arith.constant 7 : i32
    %362 = arith.subi %c7_i32_90, %361 : i32
    %363 = arith.index_cast %359 : i32 to index
    %c0_91 = arith.constant 0 : index
    %c0_92 = arith.constant 0 : index
    %364 = vector.load %arg4[%363, %c0_91, %c0_92] : memref<4x8x384xbf16, #tpu.memory_space<vmem>>, vector<1x8x384xbf16>
    %365 = vector.shape_cast %364 : vector<1x8x384xbf16> to vector<8x384xbf16>
    %366 = arith.extf %365 : vector<8x384xbf16> to vector<8x384xf32>
    %367 = arith.truncf %301 : vector<8x128xf32> to vector<8x128xbf16>
    %cst_93 = arith.constant dense<0.000000e+00> : vector<8x384xf32>
    %368 = tpu.matmul %367, %6, %cst_93 {dimension_numbers = #tpu.dot_dimension_numbers<[1], [0], [0], [1], [0, 0, 1, 1], [], []>} : vector<8x128xbf16>, vector<128x384xbf16>, vector<8x384xf32> -> vector<8x384xf32>
    %369 = vector.broadcast %7 : vector<1x384xf32> to vector<8x384xf32>
    %370 = arith.addf %368, %369 : vector<8x384xf32>
    %371 = vector.extract_strided_slice %366 {offsets = [0, 0], sizes = [8, 128], strides = [1, 1]} : vector<8x384xf32> to vector<8x128xf32>
    %372 = vector.extract_strided_slice %370 {offsets = [0, 0], sizes = [8, 128], strides = [1, 1]} : vector<8x384xf32> to vector<8x128xf32>
    %373 = arith.addf %371, %372 : vector<8x128xf32>
    %374 = arith.negf %373 : vector<8x128xf32>
    %375 = math.exp %374 : vector<8x128xf32>
    %cst_94 = arith.constant 1.000000e+00 : f32
    %376 = vector.broadcast %cst_94 : f32 to vector<8x128xf32>
    %377 = arith.addf %376, %375 : vector<8x128xf32>
    %378 = arith.divf %376, %377 : vector<8x128xf32>
    %379 = vector.extract_strided_slice %366 {offsets = [0, 128], sizes = [8, 128], strides = [1, 1]} : vector<8x384xf32> to vector<8x128xf32>
    %380 = vector.extract_strided_slice %370 {offsets = [0, 128], sizes = [8, 128], strides = [1, 1]} : vector<8x384xf32> to vector<8x128xf32>
    %381 = arith.addf %379, %380 : vector<8x128xf32>
    %382 = arith.negf %381 : vector<8x128xf32>
    %383 = math.exp %382 : vector<8x128xf32>
    %cst_95 = arith.constant 1.000000e+00 : f32
    %384 = vector.broadcast %cst_95 : f32 to vector<8x128xf32>
    %385 = arith.addf %384, %383 : vector<8x128xf32>
    %386 = arith.divf %384, %385 : vector<8x128xf32>
    %387 = vector.extract_strided_slice %366 {offsets = [0, 256], sizes = [8, 128], strides = [1, 1]} : vector<8x384xf32> to vector<8x128xf32>
    %388 = vector.extract_strided_slice %370 {offsets = [0, 256], sizes = [8, 128], strides = [1, 1]} : vector<8x384xf32> to vector<8x128xf32>
    %389 = arith.mulf %378, %388 : vector<8x128xf32>
    %390 = arith.addf %387, %389 : vector<8x128xf32>
    %391 = math.tanh %390 : vector<8x128xf32>
    %cst_96 = arith.constant 1.000000e+00 : f32
    %392 = vector.broadcast %cst_96 : f32 to vector<8x128xf32>
    %393 = arith.subf %392, %386 : vector<8x128xf32>
    %394 = arith.mulf %393, %391 : vector<8x128xf32>
    %395 = arith.mulf %386, %301 : vector<8x128xf32>
    %396 = arith.addf %394, %395 : vector<8x128xf32>
    %397 = vector.broadcast %362 : i32 to vector<8x1xi32>
    %398 = arith.cmpi slt, %397, %0 : vector<8x1xi32>
    %399 = vector.shape_cast %398 : vector<8x1xi1> to vector<8x1xi1>
    %400 = vector.broadcast %399 : vector<8x1xi1> to vector<8x128xi1>
    %401 = arith.select %400, %396, %301 : vector<8x128xi1>, vector<8x128xf32>
    %cst_97 = arith.constant 0.000000e+00 : f32
    %402 = vector.shape_cast %398 : vector<8x1xi1> to vector<8x1xi1>
    %403 = vector.broadcast %402 : vector<8x1xi1> to vector<8x128xi1>
    %404 = vector.broadcast %cst_97 : f32 to vector<8x128xf32>
    %405 = arith.select %403, %401, %404 : vector<8x128xi1>, vector<8x128xf32>
    %406 = arith.index_cast %359 : i32 to index
    %c0_98 = arith.constant 0 : index
    %c0_99 = arith.constant 0 : index
    %407 = vector.load %arg10[%406, %c0_98, %c0_99] : memref<4x8x128xf32, #tpu.memory_space<vmem>>, vector<1x8x128xf32>
    %408 = vector.shape_cast %407 : vector<1x8x128xf32> to vector<8x128xf32>
    %409 = vector.shape_cast %405 : vector<8x128xf32> to vector<1x8x128xf32>
    tpu.vector_store %arg10[%406, %c0_98, %c0_99], %409 {strides = array<i32>} : memref<4x8x128xf32, #tpu.memory_space<vmem>>, vector<1x8x128xf32>,
    %c4_i32_100 = arith.constant 4 : i32
    %c0_101 = arith.constant 0 : index
    %c0_102 = arith.constant 0 : index
    %410 = vector.load %arg12[%c0_101, %c0_102] : memref<8x128xf32, #tpu.memory_space<vmem>>, vector<8x128xf32>
    tpu.vector_store %arg12[%c0_101, %c0_102], %350 {strides = array<i32>} : memref<8x128xf32, #tpu.memory_space<vmem>>, vector<8x128xf32>,
    %c0_103 = arith.constant 0 : index
    %c0_104 = arith.constant 0 : index
    %411 = vector.load %arg13[%c0_103, %c0_104] : memref<8x128xf32, #tpu.memory_space<vmem>>, vector<8x128xf32>
    tpu.vector_store %arg13[%c0_103, %c0_104], %401 {strides = array<i32>} : memref<8x128xf32, #tpu.memory_space<vmem>>, vector<8x128xf32>,
    %c1_i32_105 = arith.constant 1 : i32
    %412 = arith.cmpi eq, %arg1, %c1_i32_105 : i32
    %413 = arith.extui %412 : i1 to i32
    %c0_i32_106 = arith.constant 0 : i32
    %414 = arith.cmpi ne, %413, %c0_i32_106 : i32
    scf.if %414 {
      %c0_107 = arith.constant 0 : index
      %c0_108 = arith.constant 0 : index
      %c0_109 = arith.constant 0 : index
      %415 = vector.load %arg11[%c0_107, %c0_108, %c0_109] : memref<2x8x128xf32, #tpu.memory_space<vmem>>, vector<1x8x128xf32>
      %416 = vector.shape_cast %415 : vector<1x8x128xf32> to vector<8x128xf32>
      %417 = vector.shape_cast %350 : vector<8x128xf32> to vector<1x8x128xf32>
      tpu.vector_store %arg11[%c0_107, %c0_108, %c0_109], %417 {strides = array<i32>} : memref<2x8x128xf32, #tpu.memory_space<vmem>>, vector<1x8x128xf32>,
      %c1 = arith.constant 1 : index
      %c0_110 = arith.constant 0 : index
      %c0_111 = arith.constant 0 : index
      %418 = vector.load %arg11[%c1, %c0_110, %c0_111] : memref<2x8x128xf32, #tpu.memory_space<vmem>>, vector<1x8x128xf32>
      %419 = vector.shape_cast %418 : vector<1x8x128xf32> to vector<8x128xf32>
      %420 = vector.shape_cast %401 : vector<8x128xf32> to vector<1x8x128xf32>
      tpu.vector_store %arg11[%c1, %c0_110, %c0_111], %420 {strides = array<i32>} : memref<2x8x128xf32, #tpu.memory_space<vmem>>, vector<1x8x128xf32>,
    } else {
    }
    return
  }
  func.func @transform_0(%arg0: i32, %arg1: i32) -> (i32, i32) {
    %c0_i32 = arith.constant 0 : i32
    %c0_i32_0 = arith.constant 0 : i32
    return %arg0, %c0_i32 : i32, i32
  }
  func.func @transform_1(%arg0: i32, %arg1: i32) -> (i32, i32, i32) {
    %c0_i32 = arith.constant 0 : i32
    %c0_i32_0 = arith.constant 0 : i32
    return %arg1, %arg0, %c0_i32 : i32, i32, i32
  }
  func.func @transform_2(%arg0: i32, %arg1: i32) -> (i32, i32, i32) {
    %c1_i32 = arith.constant 1 : i32
    %0 = arith.subi %c1_i32, %arg1 : i32
    %c0_i32 = arith.constant 0 : i32
    %c0_i32_0 = arith.constant 0 : i32
    return %0, %arg0, %c0_i32 : i32, i32, i32
  }
  func.func @transform_3(%arg0: i32, %arg1: i32) -> (i32, i32) {
    %c0_i32 = arith.constant 0 : i32
    %c0_i32_0 = arith.constant 0 : i32
    %c0_i32_1 = arith.constant 0 : i32
    return %c0_i32, %c0_i32_0 : i32, i32
  }
  func.func @transform_4(%arg0: i32, %arg1: i32) -> (i32, i32) {
    %c0_i32 = arith.constant 0 : i32
    %c0_i32_0 = arith.constant 0 : i32
    %c0_i32_1 = arith.constant 0 : i32
    return %c0_i32, %c0_i32_0 : i32, i32
  }
  func.func @transform_5(%arg0: i32, %arg1: i32) -> (i32, i32) {
    %c0_i32 = arith.constant 0 : i32
    %c0_i32_0 = arith.constant 0 : i32
    %c0_i32_1 = arith.constant 0 : i32
    return %c0_i32, %c0_i32_0 : i32, i32
  }
  func.func @transform_6(%arg0: i32, %arg1: i32) -> (i32, i32) {
    %c0_i32 = arith.constant 0 : i32
    %c0_i32_0 = arith.constant 0 : i32
    %c0_i32_1 = arith.constant 0 : i32
    return %c0_i32, %c0_i32_0 : i32, i32
  }
  func.func @transform_7(%arg0: i32, %arg1: i32) -> (i32, i32, i32) {
    %c0_i32 = arith.constant 0 : i32
    %c0_i32_0 = arith.constant 0 : i32
    return %arg1, %arg0, %c0_i32 : i32, i32, i32
  }
  func.func @transform_8(%arg0: i32, %arg1: i32) -> (i32, i32, i32) {
    %c1_i32 = arith.constant 1 : i32
    %0 = arith.subi %c1_i32, %arg1 : i32
    %c0_i32 = arith.constant 0 : i32
    %c0_i32_0 = arith.constant 0 : i32
    return %0, %arg0, %c0_i32 : i32, i32, i32
  }
  func.func @transform_9(%arg0: i32, %arg1: i32) -> (i32, i32, i32) {
    %c0_i32 = arith.constant 0 : i32
    %c0_i32_0 = arith.constant 0 : i32
    %c0_i32_1 = arith.constant 0 : i32
    return %c0_i32, %arg0, %c0_i32_0 : i32, i32, i32
  }
}

</mosaic_0001>

<bundles_post_ra>
// kernel: tpu_custom_call.1
= control target key start
LH: loop header
LB: loop body
LE: loop exit
PB: predicated region body
PF: predicated region fallthrough
CT: control target
= control target key end

     0   :  { %s3633_s0 = inlined_call_operand.vmem [shape: s32[8,1], index: 0, kind: input, shape index: {}]   ;;  %s3634_s1 = inlined_call_operand.hbm [shape: bf16[8,8,384], index: 1, kind: input, shape index: {}]   ;;  %s3635_s2 = inlined_call_operand.hbm [shape: bf16[8,8,384], index: 2, kind: input, shape index: {}]   ;;  %s3636_s3 = inlined_call_operand.hbm [shape: bf16[128,384], index: 3, kind: input, shape index: {}]   ;;  %s3637_s4 = inlined_call_operand.vmem [shape: f32[1,384], index: 4, kind: input, shape index: {}]   ;;  %s3638_s5 = inlined_call_operand.hbm [shape: bf16[128,384], index: 5, kind: input, shape index: {}]   ;;  %s3639_s6 = inlined_call_operand.vmem [shape: f32[1,384], index: 6, kind: input, shape index: {}]   ;;  %s3640_s7 = inlined_call_operand.hbm [shape: f32[8,8,128], index: 7, kind: output, shape index: {0}]   ;;  %s3641_s8 = inlined_call_operand.hbm [shape: f32[8,8,128], index: 8, kind: output, shape index: {1}]   ;;  %s3642_s9 = inlined_call_operand.hbm [shape: f32[2,8,128], index: 9, kind: output, shape index: {2}]  }
   0x1   :  { %3689 = sst [smem:[#allocation50_spill]] %s3633_s0 }
   0x2   :  { %3690 = sst [smem:[#allocation51_spill]] %s3634_s1 }
   0x3   :  { %3691 = sst [smem:[#allocation52_spill]] %s3636_s3 }
   0x4   :  { %3692 = sst [smem:[#allocation53_spill]] %s3638_s5 }
   0x5   :  { %3693 = sst [smem:[#allocation54_spill]] %s3640_s7 }
   0x6   :  { %3694 = sst [smem:[#allocation55_spill]] %s3641_s8 }
   0x7   :  { %3695 = sst [smem:[#allocation56_spill]] %s3642_s9 }
   0x8   :  { %15 = vsyncpa [#allocation5], 0 }
   0x9   :  { %17 = vsyncpa [#allocation5 + $0x1], 0 }
   0xa   :  { %18 = vsyncpa [#allocation8], 0 }
   0xb   :  { %20 = vsyncpa [#allocation8 + $0x1], 0 }
   0xc   :  { %21 = vsyncpa [#allocation11], 0 }
   0xd   :  { %22 = vsyncpa [#allocation6], 0 }
   0xe   :  { %24 = vsyncpa [#allocation6 + $0x1], 0 }
   0xf   :  { %25 = vsyncpa [#allocation14], 0 }
  0x10   :  { %27 = vsyncpa [#allocation14 + $0x1], 0  ;;  %s2825_s30 = smov 0   ;;  %s2827_s10 = smov 0  }
  0x11   :  { %s2829_s11 = smov 0   ;;  %s2831_s12 = smov 0  }
  0x12   :  { %s2833_s13 = smov 0   ;;  %s2835_s14 = smov 0  }
  0x13   :  { %s2837_s15 = smov 0   ;;  %s2839_s16 = smov 0  }
  0x14   :  { %s2841_s17 = smov 0  }
  0x15 LB: > { %3696 = sst [smem:[#allocation23_spill]] %s2744_s12  ;;  %s2871_s18 = sadd.s32 4294967295, %s2764_s17   ;;  %s2764_s17 = sphi %s2841_s17, %s33_s17   ;;  %s2760_s16 = sphi %s2839_s16, %s3788_s16   ;;  %s2756_s15 = sphi %s2837_s15, %s3787_s15   ;;  %s2752_s14 = sphi %s2835_s14, %s3780_s14   ;;  %s2748_s13 = sphi %s2833_s13, %s3786_s13   ;;  %s2744_s12 = sphi %s2831_s12, %s3785_s12   ;;  %s2740_s11 = sphi %s2829_s11, %s3784_s11   ;;  %s2736_s10 = sphi %s2827_s10, %s3783_s10   ;;  %s2732_s30 = sphi %s2825_s30, %s3782_s30  }
  0x16   : > { %3697 = sst [smem:[#allocation24_spill]] %s2752_s14  ;;  %p123_p0 = scmp.ne.s32.totalorder %s2736_s10, %s2732_s30 }
  0x17   : > { %p3645_p1 = scmp.eq.s32.totalorder %s2871_s18, 0  ;;  %p233_p2 = scmp.eq.s32.totalorder %s2871_s18, 1 }
  0x18   : > { %p1938_p3 = scmp.ge.s32.totalorder %s2764_s17, 1  ;;  %p302_p4 = scmp.lt.s32.totalorder %s2764_s17, 3 }
  0x19   : > { %p2884_p5 = por %p123_p0, %p3645_p1  ;;  %s3700_s3 = sld [smem:[#allocation52_spill]] }
  0x1a   : > { %p2888_p6 = pnand %p1938_p3, %p302_p4  ;;  %s2766_s24 = smov [#allocation9]  }
  0x1b   : > { %s322_s25 = sshll.u32 %s2766_s24, 4  ;;  %s3701_s5 = sld [smem:[#allocation53_spill]]  ;;  %s323_s25 = int_to_ptr.vmem [resolvable:$true] %s322_s25 }
  0x1c   : > { %p2269_p7 = pneg %p2888_p6  ;;  %s3643_s29 = smov 192  }
  0x1d   : > { %s3646_s21 = smov 12   ;;  %s2769_s22 = smov [#allocation10]  }
  0x1e   : > { %p2270_p8 = pnand %p2269_p7, %p3645_p1  ;;  %s339_s24 = sshll.u32 %s2769_s22, 4  ;;  %s340_s24 = int_to_ptr.vmem [resolvable:$true] %s339_s24 }
  0x1f   : > { %s320_s23 = sshll.u32 %s3700_s3, 4  ;;  %s3649_s26 = sadd.s32 4294967294, %s2764_s17   ;;  %s321_s23 = int_to_ptr.hbm [resolvable:$true] %s320_s23 }
  0x20   : > { %2272 = dma.hbm_to_vmem [thread:$0]  (!%p2270_p8), %s321_s23, 3072, %s323_s25, [#allocation8], %s3643_s29, %s3643_s29, %s3646_s21  }
  0x21   : > { %s337_s28 = sshll.u32 %s3701_s5, 4  ;;  %s42_s27 = sadd.s32 1, %s2760_s16  ;;  %s338_s28 = int_to_ptr.hbm [resolvable:$true] %s337_s28 }
  0x22   : > { %2275 = dma.hbm_to_vmem [thread:$0]  (!%p2270_p8), %s338_s28, 3072, %s340_s24, [#allocation11], %s3643_s29, %s3643_s29, %s3646_s21  }
  0x23   : > { %s80_s3 = sadd.s32 1, %s2752_s14  ;;  %p43_p10 = scmp.ge.s32.totalorder %s42_s27, 2 }
  0x24   : > { %p87_p11 = scmp.ne.s32.totalorder %s2752_s14, %s2748_s13  ;;  %p3648_p12 = scmp.eq.s32.totalorder %s2764_s17, 0 }
  0x25   : > { %p93_p13 = scmp.ne.s32.totalorder %s2748_s13, %s2744_s12  ;;  %s3790_s27 = smov (%p43_p10, %s42_s27), 0 }
  0x26   : > { %3702 = sst [smem:[#allocation25_spill]] %s3790_s27  ;;  %p2921_p3 = por %p3648_p12, %p87_p11 }
  0x27   : > { %p2927_p4 = por %p3645_p1, %p93_p13  ;;  %s75_s28 = ssub.s32 %s2760_s16, %s3790_s27 }
  0x28   : > { %p2935_p7 = por %p233_p2, %p87_p11  ;;  %p78_p8 = scmp.eq.s32.totalorder %s75_s28, 0 }
  0x29   : > { %p239_p10 = scmp.eq.s32.totalorder %s3649_s26, 1  ;;  %p2292_p9 = scmp.lt.s32.totalorder %s2764_s17, 2 }
  0x2a   : > { %s3705_s22 = scalar_select %p2935_p7, 1, 0 }
  0x2b   : > { %s356_s24 = sand.u32 1, %s2752_s14   ;;  %p2946_p1 = por %p239_p10, %p93_p13 }
  0x2c   : > { %3706 = sst [smem:[#allocation26_spill]] %s3705_s22  ;;  %p2953_p12 = por %p239_p10, %p123_p0 }
  0x2d   : > { %s2944_s29 = scalar_select %p78_p8, %s2752_s14, %s80_s3  }
  0x2e   : > { %s3708_s21 = scalar_select %p2946_p1, 1, 0 }
  0x2f   : > { %3707 = sst [smem:[#allocation27_spill]] %s2944_s29  ;;  %s2243_s28 = smul.u32 48, %s356_s24 }
  0x30   : > { %3709 = sst [smem:[#allocation28_spill]] %s3708_s21  ;;  %s2244_s26 = smul.u32 48, %s2760_s16 }
  0x31   : > { %s3710_s5 = scalar_select %p2953_p12, 1, 0 }
  0x32   : > { %p2277_p11 = pnand %p2292_p9, %p2921_p3  ;;  %s3712_s1 = sld [smem:[#allocation51_spill]] }
  0x33   : > { %3711 = sst [smem:[#allocation29_spill]] %s3710_s5  ;;  %s360_s21 = scalar_lea.vmem [#allocation4], %s2243_s28 }
  0x34   : > { %s371_s30 = sshll.u32 %s360_s21, 4  ;;  %s357_s5 = scalar_lea.sflag [#allocation5], %s356_s24  ;;  %s372_s30 = int_to_ptr.vmem [resolvable:$true] %s371_s30 }
  0x35   : > { %s3713_s9 = smov 12   ;;  %s3714_s23 = smov 192  }
  0x36   : > { %s103_s7 = ssub.s32 1, %s2760_s16  ;;  %s104_s22 = ssub.s32 1, %s3790_s27 }
  0x37   : > { %s110_s8 = sadd.s32 1, %s2740_s11  ;;  %s105_s29 = ssub.s32 %s103_s7, %s104_s22 }
  0x38   : > { %s368_s14 = scalar_lea.hbm %s3712_s1, %s2244_s26  ;;  %p117_p0 = scmp.ne.s32.totalorder %s2740_s11, %s2736_s10 }
  0x39   : > { %s369_s12 = sshll.u32 %s368_s14, 4  ;;  %p108_p13 = scmp.eq.s32.totalorder %s105_s29, 0  ;;  %s370_s12 = int_to_ptr.hbm [resolvable:$true] %s369_s12 }
  0x3a   : > { %2279 = dma.hbm_to_vmem [thread:$0]  (!%p2277_p11), %s370_s12, 768, %s372_s30, %s357_s5, %s3714_s23, %s3714_s23, %s3713_s9  }
  0x3b   : > { %s381_s26 = sand.u32 1, %s2764_s17   ;;  %p3715_p3 = scmp.eq.s32.totalorder %s2764_s17, 0 }
  0x3c   : > { %p2978_p10 = por %p233_p2, %p117_p0  ;;  %s383_s24 = sand.u32 1, %s2740_s11  }
  0x3d   : > { %p119_p8 = por %p117_p0, %p3715_p3  ;;  %s2245_s28 = smul.u32 48, %s383_s24 }
  0x3e   : > { %s2983_s21 = scalar_select %p108_p13, %s2740_s11, %s110_s8  }
  0x3f   : > { %p2280_p11 = pnand %p2292_p9, %p119_p8  ;;  %s2246_s5 = smul.u32 48, %s103_s7 }
  0x40   : > { %s385_s30 = scalar_lea.vmem [#allocation7], %s2245_s28  ;;  %s382_s27 = scalar_lea.sflag [#allocation8], %s381_s26 }
  0x41   : > { %s394_s22 = scalar_lea.hbm %s3635_s2, %s2246_s5  ;;  %s397_s29 = sshll.u32 %s385_s30, 4  ;;  %s398_s29 = int_to_ptr.vmem [resolvable:$true] %s397_s29 }
  0x42   : > { %s395_s1 = sshll.u32 %s394_s22, 4  ;;  %409 = sbr.rel (%p2888_p6) target bundleno = 920 (0x398), region = 48  ;;  %s396_s1 = int_to_ptr.hbm [resolvable:$true] %s395_s1 }
  0x43   : > { %2282 = dma.hbm_to_vmem [thread:$0]  (!%p2280_p11), %s396_s1, 768, %s398_s29, %s382_s27, %s3714_s23, %s3714_s23, %s3713_s9  }
  0x47   : > { %s2997_s7 = sand.u32 1, %s2748_s13  }
  0x48   : > { %s2247_s8 = smul.u32 48, %s2997_s7  ;;  %s412_s24 = scalar_lea.sflag [#allocation5], %s2997_s7 }
  0x4a   : > { %s3001_s28 = scalar_lea.vmem [#allocation4], %s2247_s8 }
  0x4b   : > { %2703 = dma.done.wait (%p2927_p4), %s412_s24, 768  }
  0x4c   : > { %2705 = vsyncadd (%p2927_p4), %s412_s24, 4294966528  ;;  %s421_s1 = sand.u32 1, %s2871_s18   ;;  %s423_s9 = sand.u32 1, %s2736_s10  }
  0x4d   : > { %s2248_s20 = smul.u32 48, %s423_s9  ;;  %s422_s27 = scalar_lea.sflag [#allocation8], %s421_s1 }
  0x4f   : > { %s3011_s23 = scalar_lea.vmem [#allocation7], %s2248_s20 }
  0x50   : > { %2707 = dma.done.wait (%p2884_p5), %s422_s27, 768  }
  0x51   : > { %2709 = vsyncadd (%p2884_p5), %s422_s27, 4294966528  ;;  %p3717_p6 = scmp.eq.s32.totalorder %s2871_s18, 0 }
  0x53   : > { %2711 = dma.done.wait (%p3717_p6), [#allocation8], 3072   ;;  %p3718_p9 = pmov %p3717_p6 }
  0x54   : > { %p3719_p4 = pmov %p3717_p6 }
  0x55   : > { %2713 = vsyncadd (%p3718_p9), [#allocation8], 4294964224 }
  0x56   : > { %2715 = dma.done.wait (%p3719_p4), [#allocation11], 3072   ;;  %p3720_p0 = pmov %p3719_p4 }
  0x57   : > { %s1952_s25 = sshll.u32 %s2997_s7, 5  ;;  %s1953_s26 = sshll.u32 %s423_s9, 5 }
  0x58   : > { %2717 = vsyncadd (%p3720_p0), [#allocation11], 4294964224  ;;  %s3721_s0 = sld [smem:[#allocation50_spill]]  ;;  %s3031_s19 = scalar_lea.vmem [#allocation12], %s1952_s25 }
  0x59   : > { %s3033_s3 = scalar_lea.vmem [#allocation13], %s1953_s26  ;;  %p1954_p5 = scmp.ne.s32.totalorder %s2756_s15, 0 }
  0x5b   : > { %499 = sbr.rel (%p1954_p5) target bundleno = 99 (0x63), region = 68 }
  0x5e   : > { %v3029_v0 = vld [vmem:[%s3721_s0] sm:$0xff] }
  0x60   : > { %v2770_v1 = vmov 0.0  }
  0x61   : > { %500 = vst [vmem:[#allocation2] sm:$0xff] %v2770_v1 }
  0x62   : > { %501 = vst [vmem:[#allocation3] sm:$0xff] %v2770_v1 }
  0x63 PF: > { %v2042_v2 = vld [vmem:[#allocation9 + $0xa8] sm:$0xf]  ;;  %v2215_v3 = vld [vmem:[#allocation9 + $0xb0] sm:$0xf0]  ;;  %v2214_v7 = vld [vmem:[#allocation9 + $0xac] sm:$0xf] }
  0x64   : > { %v2142_v4 = vld [vmem:[#allocation10 + $0xa8] sm:$0xf]  ;;  %v3036_v5 = vor.u32 %v2215_v3, %v2042_v2  ;;  %v2239_v6 = vld [vmem:[#allocation10 + $0xb0] sm:$0xf0]  ;;  %v2044_v8 = vld [vmem:[#allocation9 + $0xb4] sm:$0xf0] }
  0x65   : > { %v3038_v9 = vor.u32 %v2239_v6, %v2142_v4  ;;  %v3040_v10 = vor.u32 %v2214_v7, %v2044_v8  ;;  %v2030_v11 = vld [vmem:[#allocation9 + $0x90] sm:$0xf]  ;;  %v2212_v12 = vld [vmem:[#allocation9 + $0x98] sm:$0xf0]  ;;  %v2211_v16 = vld [vmem:[#allocation9 + $0x94] sm:$0xf] }
  0x66   : > { %v2130_v13 = vld [vmem:[#allocation10 + $0x90] sm:$0xf]  ;;  %712 = vmatpush.bf16.msra.mxu0 %v3036_v5  ;;  %v3043_v14 = vor.u32 %v2212_v12, %v2030_v11  ;;  %v2236_v15 = vld [vmem:[#allocation10 + $0x98] sm:$0xf0]  ;;  %v2032_v17 = vld [vmem:[#allocation9 + $0x9c] sm:$0xf0] }
  0x67   : > { %951 = vmatpush.bf16.msra.mxu3 %v3038_v9  ;;  %725 = vmatpush.bf16.msra.mxu1 %v3040_v10  ;;  %v3047_v18 = vor.u32 %v2236_v15, %v2130_v13  ;;  %v3049_v19 = vor.u32 %v2211_v16, %v2032_v17  ;;  %v2018_v20 = vld [vmem:[#allocation9 + $0x78] sm:$0xf]  ;;  %v2209_v21 = vld [vmem:[#allocation9 + $0x80] sm:$0xf0]  ;;  %v2208_v24 = vld [vmem:[#allocation9 + $0x7c] sm:$0xf] }
  0x68   : > { %v2118_v22 = vld [vmem:[#allocation10 + $0x78] sm:$0xf]  ;;  %v2233_v23 = vld [vmem:[#allocation10 + $0x80] sm:$0xf0]  ;;  %v2020_v25 = vld [vmem:[#allocation9 + $0x84] sm:$0xf0]  ;;  %v3052_v26 = vor.u32 %v2209_v21, %v2018_v20 }
  0x69   : > { %v3056_v27 = vor.u32 %v2233_v23, %v2118_v22  ;;  %v3058_v28 = vor.u32 %v2208_v24, %v2020_v25  ;;  %v2006_v29 = vld [vmem:[#allocation9 + $0x60] sm:$0xf]  ;;  %v2206_v30 = vld [vmem:[#allocation9 + $0x68] sm:$0xf0]  ;;  %v2205_v33 = vld [vmem:[#allocation9 + $0x64] sm:$0xf] }
  0x6a   : > { %713 = vmatpush.bf16.msra.mxu0 %v3043_v14  ;;  %3722 = vst [vmem:[#allocation30_spill] sm:$0xff] %v3052_v26  ;;  %v2106_v31 = vld [vmem:[#allocation10 + $0x60] sm:$0xf]  ;;  %v2230_v32 = vld [vmem:[#allocation10 + $0x68] sm:$0xf0]  ;;  %v3061_v35 = vor.u32 %v2206_v30, %v2006_v29  ;;  %s3132_s22 = sshll.u32 %s2756_s15, 2 }
  0x6b   : > { %952 = vmatpush.bf16.msra.mxu3 %v3047_v18  ;;  %726 = vmatpush.bf16.msra.mxu1 %v3049_v19  ;;  %3723 = vst [vmem:[#allocation31_spill] sm:$0xff] %v3058_v28  ;;  %v2008_v34 = vld [vmem:[#allocation9 + $0x6c] sm:$0xf0]  ;;  %v1994_v36 = vld [vmem:[#allocation9 + $0x48] sm:$0xf]  ;;  %v3065_v38 = vor.u32 %v2230_v32, %v2106_v31  ;;  %s808_s30 = ssub.s32 7, %s3132_s22 }
  0x6c   : > { %3724 = vst [vmem:[#allocation32_spill] sm:$0xff] %v3061_v35  ;;  %v2203_v37 = vld [vmem:[#allocation9 + $0x50] sm:$0xf0]  ;;  %v3067_v39 = vor.u32 %v2205_v33, %v2008_v34  ;;  %v2094_v40 = vld [vmem:[#allocation10 + $0x48] sm:$0xf]  ;;  %s1468_s29 = sadd.s32 3, %s3132_s22 }
  0x6d   : > { %v2050_v41 = vld [vmem:[#allocation9 + $0xb0] sm:$0xf]  ;;  %v2216_v42 = vld [vmem:[#allocation9 + $0xb8] sm:$0xf0]  ;;  %v2227_v43 = vld [vmem:[#allocation10 + $0x50] sm:$0xf0]  ;;  %v3072_v48 = vor.u32 %v2203_v37, %v1994_v36 }
  0x6e   : > { %714 = vmatpush.bf16.msra.mxu0 %v3052_v26  ;;  %3725 = vst [vmem:[#allocation33_spill] sm:$0xff] %v3067_v39  ;;  %v2202_v44 = vld [vmem:[#allocation9 + $0x4c] sm:$0xf]  ;;  %v1996_v45 = vld [vmem:[#allocation9 + $0x54] sm:$0xf0]  ;;  %v3069_v46 = vor.u32 %v2216_v42, %v2050_v41  ;;  %v3077_v50 = vor.u32 %v2227_v43, %v2094_v40  ;;  %v3110_v34 = vld [vmem:[#allocation2] sm:$0xff] }
  0x6f   : > { %953 = vmatpush.bf16.msra.mxu3 %v3056_v27  ;;  %727 = vmatpush.bf16.msra.mxu1 %v3058_v28  ;;  %v2038_v47 = vld [vmem:[#allocation9 + $0x98] sm:$0xf]  ;;  %3726 = vst [vmem:[#allocation34_spill] sm:$0xff] %v3072_v48  ;;  %v2213_v49 = vld [vmem:[#allocation9 + $0xa0] sm:$0xf0]  ;;  %v3079_v51 = vor.u32 %v2202_v44, %v1996_v45  ;;  %s1048_s27 = sadd.s32 1, %s3132_s22 }
  0x70   : > { %738 = vmatpush.bf16.msra.mxu2 %v3069_v46  ;;  %v1982_v52 = vld [vmem:[#allocation9 + $0x30] sm:$0xf]  ;;  %v2200_v53 = vld [vmem:[#allocation9 + $0x38] sm:$0xf0]  ;;  %v3081_v55 = vor.u32 %v2213_v49, %v2038_v47  ;;  %v2199_v57 = vld [vmem:[#allocation9 + $0x34] sm:$0xf] }
  0x71   : > { %3727 = vst [vmem:[#allocation35_spill] sm:$0xff] %v3079_v51  ;;  %v2082_v54 = vld [vmem:[#allocation10 + $0x30] sm:$0xf]  ;;  %v2224_v56 = vld [vmem:[#allocation10 + $0x38] sm:$0xf0]  ;;  %v3084_v61 = vor.u32 %v2200_v53, %v1982_v52  ;;  %v3127_v53 = vpack.c.bf16 %v3110_v34, %v3110_v34  ;;  %s1153_s25 = ssub.s32 6, %s3132_s22 }
  0x72   : > { %715 = vmatpush.bf16.msra.mxu0 %v3061_v35  ;;  %v1984_v58 = vld [vmem:[#allocation9 + $0x3c] sm:$0xf0]  ;;  %v2210_v60 = vld [vmem:[#allocation9 + $0x88] sm:$0xf0]  ;;  %v1970_v62 = vld [vmem:[#allocation9 + $0x18] sm:$0xf]  ;;  %v3091_v2 = vor.u32 %v2224_v56, %v2082_v54 }
  0x73   : > { %954 = vmatpush.bf16.msra.mxu3 %v3065_v38  ;;  %728 = vmatpush.bf16.msra.mxu1 %v3067_v39  ;;  %v2026_v59 = vld [vmem:[#allocation9 + $0x80] sm:$0xf]  ;;  %3728 = vst [vmem:[#allocation36_spill] sm:$0xff] %v3084_v61  ;;  %v2197_v63 = vld [vmem:[#allocation9 + $0x20] sm:$0xf0]  ;;  %v3093_v3 = vor.u32 %v2199_v57, %v1984_v58  ;;  %v3121_v43 = vld [vmem:[#allocation3] sm:$0xff] }
  0x74   : > { %739 = vmatpush.bf16.msra.mxu2 %v3081_v55  ;;  %v3087_v1 = vor.u32 %v2210_v60, %v2026_v59  ;;  %v2070_v4 = vld [vmem:[#allocation10 + $0x18] sm:$0xf]  ;;  %v2014_v6 = vld [vmem:[#allocation9 + $0x68] sm:$0xf]  ;;  %v2207_v7 = vld [vmem:[#allocation9 + $0x70] sm:$0xf0]  ;;  %v3096_v13 = vor.u32 %v2197_v63, %v1970_v62  ;;  %v3137_v56 = vpack.c.bf16 %v3121_v43, %v3121_v43 }
  0x75   : > { %3729 = vst [vmem:[#allocation37_spill] sm:$0xff] %v3093_v3  ;;  %v2221_v8 = vld [vmem:[#allocation10 + $0x20] sm:$0xf0]  ;;  %v2196_v11 = vld [vmem:[#allocation9 + $0x1c] sm:$0xf]  ;;  %v3099_v17 = vor.u32 %v2207_v7, %v2014_v6  ;;  %v798_v7 = vstv %s3132_s22  ;;  %s1573_s26 = ssub.s32 4, %s3132_s22 }
  0x76   : > { %716 = vmatpush.bf16.msra.mxu0 %v3072_v48  ;;  %v1972_v12 = vld [vmem:[#allocation9 + $0x24] sm:$0xf0]  ;;  %3730 = vst [vmem:[#allocation38_spill] sm:$0xff] %v3096_v13  ;;  %v1958_v15 = vld [vmem:[#allocation9] sm:$0xf]  ;;  %v3103_v20 = vor.u32 %v2221_v8, %v2070_v4  ;;  %vm799_vm0 = vcmp.lt.s32.totalorder %v798_v7, %v3029_v0  ;;  %s1258_s5 = sadd.s32 2, %s3132_s22 }
  0x77   : > { %955 = vmatpush.bf16.msra.mxu3 %v3077_v50  ;;  %729 = vmatpush.bf16.msra.mxu1 %v3079_v51  ;;  %v2194_v16 = vld [vmem:[#allocation9 + $0x8] sm:$0xf0]  ;;  %v3105_v21 = vor.u32 %v2196_v11, %v1972_v12  ;;  %v2058_v22 = vld [vmem:[#allocation10] sm:$0xf]  ;;  %v2002_v23 = vld [vmem:[#allocation9 + $0x50] sm:$0xf] }
  0x78   : > { %740 = vmatpush.bf16.msra.mxu2 %v3087_v1  ;;  %v2204_v24 = vld [vmem:[#allocation9 + $0x58] sm:$0xf0]  ;;  %v2218_v25 = vld [vmem:[#allocation10 + $0x8] sm:$0xf0]  ;;  %v2144_v30 = vld [vmem:[#allocation10 + $0xb4] sm:$0xf0]  ;;  %v3108_v33 = vor.u32 %v2194_v16, %v1958_v15 }
  0x79   : > { %3731 = vst [vmem:[#allocation39_spill] sm:$0xff] %v3105_v21  ;;  %v2238_v29 = vld [vmem:[#allocation10 + $0xac] sm:$0xf]  ;;  %v2193_v31 = vld [vmem:[#allocation9 + $0x4] sm:$0xf]  ;;  %v3113_v40 = vor.u32 %v2204_v24, %v2002_v23  ;;  %v3117_v41 = vor.u32 %v2218_v25, %v2058_v22  ;;  %v3659_v16 = vmov 0  }
  0x7a   : > { %717 = vmatpush.bf16.msra.mxu0 %v3084_v61  ;;  %v1960_v32 = vld [vmem:[#allocation9 + $0xc] sm:$0xf0]  ;;  %3732 = vst [vmem:[#allocation40_spill] sm:$0xff] %v3108_v33  ;;  %v2240_v37 = vld [vmem:[#allocation10 + $0xb8] sm:$0xf0]  ;;  %v3119_v42 = vor.u32 %v2238_v29, %v2144_v30  ;;  %v800_v22 = vsel %vm799_vm0, 1, %v3659_v16  ;;  %2379 = vset.pattern.permute.xlu0 %v3659_v16 }
  0x7b   : > { %956 = vmatpush.bf16.msra.mxu3 %v3091_v2  ;;  %730 = vmatpush.bf16.msra.mxu1 %v3093_v3  ;;  %v2150_v36 = vld [vmem:[#allocation10 + $0xb0] sm:$0xf]  ;;  %v1990_v44 = vld [vmem:[#allocation9 + $0x38] sm:$0xf]  ;;  %v2201_v45 = vld [vmem:[#allocation9 + $0x40] sm:$0xf0]  ;;  %v3123_v47 = vor.u32 %v2193_v31, %v1960_v32  ;;  %v1037_v32 = vstv %s808_s30 }
  0x7c   : > { %741 = vmatpush.bf16.msra.mxu2 %v3099_v17  ;;  %v2235_v49 = vld [vmem:[#allocation10 + $0x94] sm:$0xf]  ;;  %v2132_v52 = vld [vmem:[#allocation10 + $0x9c] sm:$0xf0]  ;;  %v3129_v54 = vor.u32 %v2240_v37, %v2150_v36  ;;  %v2138_v57 = vld [vmem:[#allocation10 + $0x98] sm:$0xf]  ;;  %v3140_v59 = vor.u32 %v2201_v45, %v1990_v44  ;;  %802 = vperm.xlu0 %2379, %v800_v22   ;;  %vm1038_vm1 = vcmp.lt.s32.totalorder %v1037_v32, %v3029_v0 }
  0x7d   : > { %3733 = vst [vmem:[#allocation41_spill] sm:$0xff] %v3123_v47  ;;  %v2237_v58 = vld [vmem:[#allocation10 + $0xa0] sm:$0xf0]  ;;  %v3144_v60 = vor.u32 %v2235_v49, %v2132_v52  ;;  %v1978_v62 = vld [vmem:[#allocation9 + $0x20] sm:$0xf]  ;;  %2380 = vset.pattern.permute.xlu1 %v3659_v16  ;;  %2381 = vset.pattern.permute.xlu2 %v3659_v16  ;;  %s1363_s12 = ssub.s32 5, %s3132_s22 }
  0x7e   : > { %718 = vmatpush.bf16.msra.mxu0 %v3096_v13  ;;  %v2198_v63 = vld [vmem:[#allocation9 + $0x28] sm:$0xf0]  ;;  %v2232_v4 = vld [vmem:[#allocation10 + $0x7c] sm:$0xf]  ;;  %v2120_v6 = vld [vmem:[#allocation10 + $0x84] sm:$0xf0]  ;;  %v3151_v8 = vor.u32 %v2237_v58, %v2138_v57 }
  0x7f   : > { %957 = vmatpush.bf16.msra.mxu3 %v3103_v20  ;;  %731 = vmatpush.bf16.msra.mxu1 %v3105_v21  ;;  %v2126_v11 = vld [vmem:[#allocation10 + $0x80] sm:$0xf]  ;;  %v2234_v12 = vld [vmem:[#allocation10 + $0x88] sm:$0xf0]  ;;  %v3156_v15 = vor.u32 %v2198_v63, %v1978_v62  ;;  %v3162_v23 = vor.u32 %v2232_v4, %v2120_v6  ;;  %v1966_v24 = vld [vmem:[#allocation9 + $0x8] sm:$0xf] }
  0x80   : > { %742 = vmatpush.bf16.msra.mxu2 %v3113_v40  ;;  %v2195_v25 = vld [vmem:[#allocation9 + $0x10] sm:$0xf0]  ;;  %v2229_v29 = vld [vmem:[#allocation10 + $0x64] sm:$0xf]  ;;  %v2108_v30 = vld [vmem:[#allocation10 + $0x6c] sm:$0xf0]  ;;  %v3167_v31 = vor.u32 %v2234_v12, %v2126_v11  ;;  %v1562_v12 = vstv %s1468_s29 }
  0x81   : > { %v2114_v36 = vld [vmem:[#allocation10 + $0x68] sm:$0xf]  ;;  %v2231_v37 = vld [vmem:[#allocation10 + $0x70] sm:$0xf0]  ;;  %v3170_v44 = vor.u32 %v2195_v25, %v1966_v24  ;;  %v3174_v45 = vor.u32 %v2229_v29, %v2108_v30  ;;  %v2226_v49 = vld [vmem:[#allocation10 + $0x4c] sm:$0xf]  ;;  %vm1563_vm2 = vcmp.lt.s32.totalorder %v1562_v12, %v3029_v0 }
  0x82   : > { %719 = vmatpush.bf16.msra.mxu0 %v3108_v33  ;;  %v2096_v52 = vld [vmem:[#allocation10 + $0x54] sm:$0xf0]  ;;  %v3180_v57 = vor.u32 %v2231_v37, %v2114_v36  ;;  %v2102_v58 = vld [vmem:[#allocation10 + $0x50] sm:$0xf]  ;;  %v2228_v62 = vld [vmem:[#allocation10 + $0x58] sm:$0xf0] }
  0x83   : > { %958 = vmatpush.bf16.msra.mxu3 %v3117_v41  ;;  %732 = vmatpush.bf16.msra.mxu1 %v3123_v47  ;;  %v3185_v63 = vor.u32 %v2226_v49, %v2096_v52  ;;  %v1039_v4 = vsel %vm1038_vm1, 1, %v3659_v16  ;;  %v2223_v6 = vld [vmem:[#allocation10 + $0x34] sm:$0xf]  ;;  %v2084_v7 = vld [vmem:[#allocation10 + $0x3c] sm:$0xf0]  ;;  %v3191_v11 = vor.u32 %v2228_v62, %v2102_v58  ;;  %v1564_v49 = vsel %vm1563_vm2, 1, %v3659_v16 }
  0x84   : > { %743 = vmatpush.bf16.msra.mxu2 %v3140_v59  ;;  %v2090_v22 = vld [vmem:[#allocation10 + $0x38] sm:$0xf]  ;;  %v2225_v24 = vld [vmem:[#allocation10 + $0x40] sm:$0xf0]  ;;  %1041 = vperm.xlu0 %2379, %v1039_v4   ;;  %v3195_v25 = vor.u32 %v2223_v6, %v2084_v7  ;;  %v2220_v29 = vld [vmem:[#allocation10 + $0x1c] sm:$0xf] }
  0x85   : > { %720 = vmatmul.bf16.vlgmr.msra.gmra.mxu0 %v3127_v53  ;;  %v2072_v30 = vld [vmem:[#allocation10 + $0x24] sm:$0xf0]  ;;  %v3201_v32 = vor.u32 %v2225_v24, %v2090_v22  ;;  %v2222_v36 = vld [vmem:[#allocation10 + $0x28] sm:$0xf0]  ;;  %v2217_v52 = vld [vmem:[#allocation10 + $0x4] sm:$0xf] }
  0x86   : > { %964 = vmatpush.bf16.msrb.mxu0 %v3119_v42  ;;  %959 = vmatmul.bf16.vlgmr.msra.gmra.mxu3 %v3137_v56  ;;  %v3204_v37 = vor.u32 %v2220_v29, %v2072_v30  ;;  %v2060_v58 = vld [vmem:[#allocation10 + $0xc] sm:$0xf0]  ;;  %v2066_v4 = vld [vmem:[#allocation10 + $0x8] sm:$0xf]  ;;  %v2219_v6 = vld [vmem:[#allocation10 + $0x10] sm:$0xf0] }
  0x87   : > { %1069 = vmatpush.bf16.msrb.mxu3 %v3040_v10  ;;  %977 = vmatpush.bf16.msrb.mxu1 %v3129_v54  ;;  %3734 = vst [vmem:[#allocation42_spill] sm:$0xff] %v3201_v32  ;;  %v3213_v7 = vor.u32 %v2217_v52, %v2060_v58  ;;  %v3218_v12 = vor.u32 %v2219_v6, %v2066_v4  ;;  %v571_v22 = vld [vmem:[%s3001_s28] sm:$0xff]  ;;  %p2182_p13 = scmp.ne.s32.totalorder %s2756_s15, 1 }
  0x88   : > { %733 = vmatmul.bf16.vlgmr.msra.gmra.mxu1 %v3127_v53  ;;  %744 = vmatpush.bf16.msra.mxu2 %v3156_v15  ;;  %v573_v29 = vunpack.c.l.bf16 %v571_v22  ;;  %v3289_v52 = vld [vmem:[%s3639_s6] sm:$0x7]  ;;  %v2054_v16 = vld [vmem:[%s3011_s23 + $0x24] sm:$0xff] }
  0x89   : > { %3736 = vst [vmem:[#allocation44_spill] sm:$0xff] %v3218_v12 }
  0x8a   : > { %965 = vmatpush.bf16.msrb.mxu0 %v3144_v60 }
  0x8b   : > { %1070 = vmatpush.bf16.msrb.mxu3 %v3049_v19  ;;  %978 = vmatpush.bf16.msrb.mxu1 %v3151_v8 }
  0x8c   : > { %745 = vmatpush.bf16.msra.mxu2 %v3170_v44  ;;  %1566 = vperm.xlu0 %2379, %v1564_v49   ;;  %v574_v49 = vunpack.c.h.bf16 %v571_v22 }
  0x8e   : > { %966 = vmatpush.bf16.msrb.mxu0 %v3162_v23 }
  0x8f   : > { %1071 = vmatpush.bf16.msrb.mxu3 %v3058_v28  ;;  %979 = vmatpush.bf16.msrb.mxu1 %v3167_v31 }
  0x90   : > { %1056 = vmatpush.bf16.msrb.mxu2 %v3036_v5 }
  0x91   : > { %746 = vmatmul.bf16.vlgmr.msra.gmra.mxu2 %v3127_v53  ;;  %v2078_v53 = vld [vmem:[#allocation10 + $0x20] sm:$0xf] }
  0x92   : > { %967 = vmatpush.bf16.msrb.mxu0 %v3174_v45  ;;  %v3210_v62 = vor.u32 %v2222_v36, %v2078_v53 }
  0x93   : > { %1072 = vmatpush.bf16.msrb.mxu3 %v3067_v39  ;;  %980 = vmatpush.bf16.msrb.mxu1 %v3180_v57 }
  0x94   : > { %1057 = vmatpush.bf16.msrb.mxu2 %v3043_v14  ;;  %3735 = vst [vmem:[#allocation43_spill] sm:$0xff] %v3210_v62 }
  0x96   : > { %968 = vmatpush.bf16.msrb.mxu0 %v3185_v63 }
  0x97   : > { %1073 = vmatpush.bf16.msrb.mxu3 %v3079_v51  ;;  %981 = vmatpush.bf16.msrb.mxu1 %v3191_v11 }
  0x98   : > { %1058 = vmatpush.bf16.msrb.mxu2 %v3052_v26 }
  0x9a   : > { %969 = vmatpush.bf16.msrb.mxu0 %v3195_v25 }
  0x9b   : > { %1074 = vmatpush.bf16.msrb.mxu3 %v3093_v3  ;;  %982 = vmatpush.bf16.msrb.mxu1 %v3201_v32 }
  0x9c   : > { %1059 = vmatpush.bf16.msrb.mxu2 %v3061_v35 }
  0x9e   : > { %970 = vmatpush.bf16.msrb.mxu0 %v3204_v37 }
  0x9f   : > { %1075 = vmatpush.bf16.msrb.mxu3 %v3105_v21  ;;  %983 = vmatpush.bf16.msrb.mxu1 %v3210_v62 }
  0xa0   : > { %1060 = vmatpush.bf16.msrb.mxu2 %v3072_v48 }
  0xa2   : > { %971 = vmatpush.bf16.msrb.mxu0 %v3213_v7 }
  0xa3   : > { %1076 = vmatpush.bf16.msrb.mxu3 %v3123_v47  ;;  %984 = vmatpush.bf16.msrb.mxu1 %v3218_v12 }
  0xa4   : > { %1061 = vmatpush.bf16.msrb.mxu2 %v3084_v61 }
  0xa5   : > { %972 = vmatmul.bf16.vlgmr.msrb.gmra.mxu0 %v3137_v56 }
  0xa6   : > { %1082 = vmatpush.bf16.msra.mxu0 %v3069_v46  ;;  %985 = vmatmul.bf16.vlgmr.msrb.gmra.mxu1 %v3137_v56  ;;  %v534_v56 = vld [vmem:[%s3637_s4] sm:$0x7] }
  0xa7   : > { %1187 = vmatpush.bf16.msra.mxu3 %v3129_v54  ;;  %1161 = vmatpush.bf16.msra.mxu1 %v3038_v9  ;;  %v3281_v24 = vperm.slane %v534_v56, 0  ;;  %v3283_v30 = vperm.slane %v534_v56, 1 }
  0xa8   : > { %1062 = vmatpush.bf16.msrb.mxu2 %v3096_v13 }
  0xa9   : > { %3737 = vst [vmem:[#allocation45_spill] sm:$0xff] %v3281_v24 }
  0xaa   : > { %1083 = vmatpush.bf16.msra.mxu0 %v3081_v55  ;;  %3738 = vst [vmem:[#allocation46_spill] sm:$0xff] %v3283_v30 }
  0xab   : > { %1188 = vmatpush.bf16.msra.mxu3 %v3151_v8  ;;  %1162 = vmatpush.bf16.msra.mxu1 %v3047_v18 }
  0xac   : > { %1063 = vmatpush.bf16.msrb.mxu2 %v3108_v33 }
  0xae   : > { %1084 = vmatpush.bf16.msra.mxu0 %v3087_v1 }
  0xaf   : > { %1189 = vmatpush.bf16.msra.mxu3 %v3167_v31  ;;  %1163 = vmatpush.bf16.msra.mxu1 %v3056_v27 }
  0xb0   : > { %1174 = vmatpush.bf16.msra.mxu2 %v3119_v42 }
  0xb2   : > { %1085 = vmatpush.bf16.msra.mxu0 %v3099_v17 }
  0xb3   : > { %1190 = vmatpush.bf16.msra.mxu3 %v3180_v57  ;;  %1164 = vmatpush.bf16.msra.mxu1 %v3065_v38 }
  0xb4   : > { %1175 = vmatpush.bf16.msra.mxu2 %v3144_v60 }
  0xb6   : > { %1086 = vmatpush.bf16.msra.mxu0 %v3113_v40 }
  0xb7   : > { %1191 = vmatpush.bf16.msra.mxu3 %v3191_v11  ;;  %1165 = vmatpush.bf16.msra.mxu1 %v3077_v50 }
  0xb8   : > { %1176 = vmatpush.bf16.msra.mxu2 %v3162_v23 }
  0xba   : > { %1087 = vmatpush.bf16.msra.mxu0 %v3140_v59 }
  0xbb   : > { %1192 = vmatpush.bf16.msra.mxu3 %v3201_v32  ;;  %1166 = vmatpush.bf16.msra.mxu1 %v3091_v2 }
  0xbc   : > { %1177 = vmatpush.bf16.msra.mxu2 %v3174_v45 }
  0xbe   : > { %1088 = vmatpush.bf16.msra.mxu0 %v3156_v15 }
  0xbf   : > { %1193 = vmatpush.bf16.msra.mxu3 %v3210_v62  ;;  %1167 = vmatpush.bf16.msra.mxu1 %v3103_v20 }
  0xc0   : > { %1178 = vmatpush.bf16.msra.mxu2 %v3185_v63 }
  0xc2   : > { %1089 = vmatpush.bf16.msra.mxu0 %v3170_v44 }
  0xc3   : > { %1194 = vmatpush.bf16.msra.mxu3 %v3218_v12  ;;  %1168 = vmatpush.bf16.msra.mxu1 %v3117_v41 }
  0xc4   : > { %1179 = vmatpush.bf16.msra.mxu2 %v3195_v25 }
  0xc6   : > { %1266 = vmatpush.bf16.msrb.mxu0 %v3036_v5 }
  0xc7   : > { %1279 = vmatpush.bf16.msrb.mxu1 %v3040_v10 }
  0xc8   : > { %1180 = vmatpush.bf16.msra.mxu2 %v3204_v37 }
  0xca   : > { %1267 = vmatpush.bf16.msrb.mxu0 %v3043_v14 }
  0xcb   : > { %1280 = vmatpush.bf16.msrb.mxu1 %v3049_v19 }
  0xcc   : > { %1181 = vmatpush.bf16.msra.mxu2 %v3213_v7 }
  0xce   : > { %1268 = vmatpush.bf16.msrb.mxu0 %v3052_v26 }
  0xcf   : > { %1281 = vmatpush.bf16.msrb.mxu1 %v3058_v28 }
  0xd2   : > { %1269 = vmatpush.bf16.msrb.mxu0 %v3061_v35 }
  0xd3   : > { %1282 = vmatpush.bf16.msrb.mxu1 %v3067_v39 }
  0xd6   : > { %1270 = vmatpush.bf16.msrb.mxu0 %v3072_v48  ;;  %v813_v48 = vunpack.c.h.bf16 %v2054_v16 }
  0xd7   : > { %1283 = vmatpush.bf16.msrb.mxu1 %v3079_v51 }
  0xda   : > { %1271 = vmatpush.bf16.msrb.mxu0 %v3084_v61 }
  0xdb   : > { %1284 = vmatpush.bf16.msrb.mxu1 %v3093_v3 }
  0xde   : > { %1272 = vmatpush.bf16.msrb.mxu0 %v3096_v13  ;;  %v812_v13 = vunpack.c.l.bf16 %v2054_v16 }
  0xdf   : > { %1285 = vmatpush.bf16.msrb.mxu1 %v3105_v21 }
  0xe2   : > { %1273 = vmatpush.bf16.msrb.mxu0 %v3108_v33 }
  0xe3   : > { %1286 = vmatpush.bf16.msrb.mxu1 %v3123_v47  ;;  %v3294_v47 = vperm.slane %v3289_v52, 0 }
  0xe5   : > { %3739 = vst [vmem:[#allocation47_spill] sm:$0xff] %v3294_v47 }
 0x102   : > { %v721_v53 = vpop.f32.mrf.mxu0 }
 0x103   : > { %v722_v36 = vadd.f32 %v721_v53, %v3281_v24 }
 0x105   : > { %v734_v58 = vpop.f32.mrf.mxu1  ;;  %v751_v4 = vadd.f32 %v722_v36, %v573_v29 }
 0x106   : > { %v735_v6 = vadd.f32 %v734_v58, %v3283_v30 }
 0x107   : > { %v2052_v33 = vmul.f32 -1.442695, %v751_v4 }
 0x108   : > { %v771_v21 = vadd.f32 %v735_v6, %v574_v49 }
 0x109   : > { %2382 = vpow2.f32 %v2052_v33  ;;  %v960_v53 = vpop.f32.mrf.mxu3 }
 0x10a   : > { %v2053_v3 = vmul.f32 -1.442695, %v771_v21  ;;  %v961_v22 = vadd.f32 %v960_v53, %v3294_v47  ;;  %v723_v24 = vpop.f32.mrf.mxu0 }
 0x10c   : > { %2384 = vpow2.f32 %v2053_v3  ;;  %v990_v61 = vadd.f32 %v961_v22, %v812_v13 }
 0x10d   : > { %v736_v12 = vpop.f32.mrf.mxu1 }
 0x10e   : > { %v2152_v51 = vmul.f32 -1.442695, %v990_v61  ;;  %v572_v12 = vld [vmem:[%s3001_s28 + $0x8] sm:$0xf]  ;;  %v3301_v61 = vperm.slane %v534_v56, 2 }
 0x10f   : > { %v2383_v29 = vpop.eup %2382  ;;  %v575_v47 = vunpack.c.l.bf16 %v572_v12 }
 0x110   : > { %v755_v36 = vadd.f32 1.0, %v2383_v29  ;;  %2386 = vpow2.f32 %v2152_v51  ;;  %3740 = vst [vmem:[#allocation48_spill] sm:$0xff] %v3301_v61 }
 0x111   : > { %v962_v30 = vpop.f32.mrf.mxu3 }
 0x112   : > { %v2385_v58 = vpop.eup %2384  ;;  %2388 = vrcp.f32 %v755_v36  ;;  %vm761_vm3 = vweird.f32 %v755_v36  ;;  %v767_v51 = vand.u32 2147483648, %v755_v36  ;;  %v3304_v30 = vperm.slane %v3289_v52, 1 }
 0x113   : > { %v775_v4 = vadd.f32 1.0, %v2385_v58  ;;  %v765_v58 = vand.u32 2147483647, %v755_v36 }
 0x114   : > { %v747_v49 = vpop.f32.mrf.mxu2  ;;  %3741 = vst [vmem:[#allocation49_spill] sm:$0xff] %v3304_v30  ;;  %v768_v32 = vor.u32 1.1754944e-38, %v767_v51 }
 0x115   : > { %2390 = vrcp.f32 %v775_v4  ;;  %v748_v39 = vadd.f32 %v747_v49, %v3301_v61  ;;  %vm781_vm5 = vweird.f32 %v775_v4  ;;  %vm766_vm8 = vcmp.eq.f32.partialorder %v765_v58, 8.507059e+37 }
 0x116   : > { %v2387_v33 = vpop.eup %2386  ;;  %v785_v16 = vand.u32 2147483647, %v775_v4  ;;  %v787_v12 = vand.u32 2147483648, %v775_v4 }
 0x117   : > { %v3297_v21 = vadd.f32 1.0, %v2387_v33 }
 0x118   : > { %v2389_v6 = vpop.eup %2388  ;;  %vm786_vm10 = vcmp.eq.f32.partialorder %v785_v16, 8.507059e+37 }
 0x119   : > { %2392 = vrcp.f32 %v3297_v21  ;;  %v757_v3 = vmul.f32 %v2389_v6, %v755_v36  ;;  %vm762_vm4 = vweird.f32 %v2389_v6  ;;  %vm1000_vm11 = vweird.f32 %v3297_v21 }
 0x11a   : > { %vm763_vm6 = vmor %vm761_vm3, %vm762_vm4 }
 0x11b   : > { %v2391_v13 = vpop.eup %2390  ;;  %v758_v24 = vsub.f32 1.0, %v757_v3 }
 0x11c   : > { %v777_v53 = vmul.f32 %v2391_v13, %v775_v4  ;;  %v749_v22 = vpop.f32.mrf.mxu2  ;;  %vm782_vm7 = vweird.f32 %v2391_v13  ;;  %v1142_v4 = vstv %s1048_s27 }
 0x11d   : > { %v759_v29 = vmul.f32 %v2389_v6, %v758_v24  ;;  %vm783_vm9 = vmor %vm781_vm5, %vm782_vm7  ;;  %vm1143_vm14 = vcmp.lt.s32.totalorder %v1142_v4, %v3029_v0 }
 0x11e   : > { %v778_v33 = vsub.f32 1.0, %v777_v53 }
 0x11f   : > { %v3306_v62 = vpop.eup %2392  ;;  %v760_v56 = vadd.f32 %v2389_v6, %v759_v29 }
 0x120   : > { %v779_v3 = vmul.f32 %v2391_v13, %v778_v33  ;;  %v996_v24 = vmul.f32 %v3306_v62, %v3297_v21  ;;  %vm1001_vm12 = vweird.f32 %v3306_v62 }
 0x121   : > { %v764_v53 = vsel %vm763_vm6, %v2389_v6, %v760_v56  ;;  %vm3321_vm13 = vmor %vm1000_vm11, %vm1001_vm12 }
 0x122   : > { %v973_v35 = vpop.f32.mrf.mxu0  ;;  %v769_v26 = vsel %vm766_vm8, %v768_v32, %v764_v53  ;;  %v780_v29 = vadd.f32 %v2391_v13, %v779_v3  ;;  %v997_v33 = vsub.f32 1.0, %v996_v24  ;;  %v3744_v24 = vmov 0  }
 0x123   : > { %v974_v28 = vadd.f32 %v973_v35, %v3304_v30  ;;  %v986_v22 = vpop.f32.mrf.mxu1  ;;  %v791_v61 = vmul.f32 %v769_v26, %v748_v39  ;;  %v788_v35 = vor.u32 1.1754944e-38, %v787_v12  ;;  %v1006_v26 = vand.u32 2147483648, %v3297_v21  ;;  %v803_v12 = vpop.permute.xlu0 %802 }
 0x124   : > { %v998_v30 = vmul.f32 %v3306_v62, %v997_v33  ;;  %v784_v6 = vsel %vm783_vm9, %v2391_v13, %v780_v29  ;;  %v3327_v13 = vperm.slane %v3289_v52, 2  ;;  %v1247_v52 = vstv %s1153_s25 }
 0x125   : > { %v1010_v49 = vadd.f32 %v974_v28, %v813_v48  ;;  %v792_v51 = vadd.f32 %v791_v61, %v575_v47  ;;  %v789_v28 = vsel %vm786_vm10, %v788_v35, %v784_v6  ;;  %v1004_v48 = vand.u32 2147483647, %v3297_v21 }
 0x126   : > { %v999_v39 = vadd.f32 %v3306_v62, %v998_v30  ;;  %v794_v56 = vsub.f32 1.0, %v789_v28  ;;  %v1007_v3 = vor.u32 1.1754944e-38, %v1006_v26  ;;  %v1144_v30 = vsel %vm1143_vm14, 1, %v3744_v24 }
 0x127   : > { %v2153_v36 = vmul.f32 -1.442695, %v1010_v49  ;;  %vm1005_vm15 = vcmp.eq.f32.partialorder %v1004_v48, 8.507059e+37  ;;  %1146 = vperm.xlu1 %2380, %v1144_v30   ;;  %v796_v29 = vmul.f32 %v789_v28, %v3110_v34  ;;  %vm804_vm0 = vcmp.eq.s32.totalorder %v803_v12, 1 }
 0x128   : > { %v1003_v16 = vsel %vm3321_vm13, %v3306_v62, %v999_v39  ;;  %v987_v33 = vadd.f32 %v986_v22, %v3327_v13  ;;  %vm1248_vm1 = vcmp.lt.s32.totalorder %v1247_v52, %v3029_v0  ;;  %v1666_v22 = vstv %s1573_s26 }
 0x129   : > { %2394 = vpow2.f32 %v2153_v36  ;;  %v1008_v35 = vsel %vm1005_vm15, %v1007_v3, %v1003_v16  ;;  %v1249_v39 = vsel %vm1248_vm1, 1, %v3744_v24  ;;  %vm1667_vm2 = vcmp.lt.s32.totalorder %v1666_v22, %v3029_v0  ;;  %v3755_v22 = vld [vmem:[#allocation37_spill] sm:$0xff] }
 0x12a   : > { %2396 = vtanh.f32 %v792_v51  ;;  %v975_v58 = vpop.f32.mrf.mxu0  ;;  %v2055_v51 = vld [vmem:[%s3011_s23 + $0x2c] sm:$0xf]  ;;  %v1030_v26 = vmul.f32 %v1008_v35, %v987_v33  ;;  %v1668_v3 = vsel %vm1667_vm2, 1, %v3744_v24 }
 0x12b   : > { %v988_v47 = vpop.f32.mrf.mxu1  ;;  %v814_v58 = vunpack.c.l.bf16 %v2055_v51  ;;  %v1042_v33 = vpop.permute.xlu0 %1041 }
 0x12c   : > { %vm1043_vm7 = vcmp.eq.s32.totalorder %v1042_v33, 1 }
 0x12d   : > { %v1031_v32 = vadd.f32 %v1030_v26, %v814_v58  ;;  %v3746_v58 = vld [vmem:[#allocation31_spill] sm:$0xff]  ;;  %v3747_v26 = vld [vmem:[#allocation42_spill] sm:$0xff] }
 0x12f   : > { %v2395_v61 = vpop.eup %2394  ;;  %1251 = vperm.xlu1 %2380, %v1249_v39   ;;  %v3751_v39 = vld [vmem:[#allocation34_spill] sm:$0xff] }
 0x130   : > { %v2397_v53 = vpop.eup %2396  ;;  %v1014_v21 = vadd.f32 1.0, %v2395_v61 }
 0x131   : > { %v795_v49 = vmul.f32 %v2397_v53, %v794_v56 }
 0x132   : > { %2398 = vrcp.f32 %v1014_v21  ;;  %v1026_v4 = vand.u32 2147483648, %v1014_v21  ;;  %v1024_v56 = vand.u32 2147483647, %v1014_v21  ;;  %vm1020_vm4 = vweird.f32 %v1014_v21 }
 0x133   : > { %v797_v36 = vadd.f32 %v796_v29, %v795_v49  ;;  %2400 = vtanh.f32 %v1031_v32  ;;  %v3757_v32 = vld [vmem:[#allocation39_spill] sm:$0xff] }
 0x134   : > { %v1027_v53 = vor.u32 1.1754944e-38, %v1026_v4  ;;  %vm1025_vm6 = vcmp.eq.f32.partialorder %v1024_v56, 8.507059e+37  ;;  %v3759_v4 = vld [vmem:[#allocation41_spill] sm:$0xff] }
 0x135   : > { %v3339_v62 = vsel %vm804_vm0, %v797_v36, %v3110_v34  ;;  %v806_v6 = vsel %vm804_vm0, %v797_v36, 0.0  ;;  %v2155_v56 = vld [vmem:[%s3001_s28 + $0xc] sm:$0xff] }
 0x136   : > { %807 = vst [vmem:[%s3031_s19] sm:$0xff] %v806_v6  ;;  %v1055_v28 = vpack.c.bf16 %v3339_v62, %v3339_v62 }
 0x137   : > { %1670 = vperm.xlu1 %2380, %v1668_v3   ;;  %v1052_v3 = vunpack.c.l.bf16 %v2155_v56 }
 0x138   : > { %v2399_v48 = vpop.eup %2398  ;;  %1064 = vmatmul.bf16.vlgmr.msrb.gmra.mxu2 %v1055_v28  ;;  %1077 = vmatmul.bf16.vlgmr.msrb.gmra.mxu3 %v1055_v28 }
 0x139   : > { %v1016_v47 = vmul.f32 %v2399_v48, %v1014_v21  ;;  %1090 = vmatmul.bf16.vlgmr.msra.gmra.mxu0 %v1055_v28  ;;  %1292 = vmatpush.bf16.msrb.mxu2 %v3069_v46  ;;  %vm1021_vm3 = vweird.f32 %v2399_v48  ;;  %v2401_v49 = vpop.eup %2400  ;;  %v3748_v28 = vld [vmem:[#allocation32_spill] sm:$0xff] }
 0x13a   : > { %1371 = vmatpush.bf16.msrb.mxu3 %v3038_v9  ;;  %1384 = vmatpush.bf16.msra.mxu0 %v3119_v42  ;;  %vm1022_vm5 = vmor %vm1020_vm4, %vm1021_vm3 }
 0x13b   : > { %v1017_v34 = vsub.f32 1.0, %v1016_v47  ;;  %v3756_v47 = vld [vmem:[#allocation38_spill] sm:$0xff] }
 0x13d   : > { %v1018_v61 = vmul.f32 %v2399_v48, %v1017_v34  ;;  %1293 = vmatpush.bf16.msrb.mxu2 %v3081_v55  ;;  %v3758_v34 = vld [vmem:[#allocation40_spill] sm:$0xff] }
 0x13e   : > { %1372 = vmatpush.bf16.msrb.mxu3 %v3047_v18  ;;  %1385 = vmatpush.bf16.msra.mxu0 %v3144_v60 }
 0x13f   : > { %v1019_v30 = vadd.f32 %v2399_v48, %v1018_v61 }
 0x141   : > { %v1023_v16 = vsel %vm1022_vm5, %v2399_v48, %v1019_v30  ;;  %1294 = vmatpush.bf16.msrb.mxu2 %v3087_v1  ;;  %v3754_v48 = vld [vmem:[#allocation36_spill] sm:$0xff]  ;;  %v1053_v30 = vunpack.c.h.bf16 %v2155_v56 }
 0x142   : > { %v1028_v52 = vsel %vm1025_vm6, %v1027_v53, %v1023_v16  ;;  %1373 = vmatpush.bf16.msrb.mxu3 %v3056_v27  ;;  %1386 = vmatpush.bf16.msra.mxu0 %v3162_v23 }
 0x143   : > { %v1033_v12 = vsub.f32 1.0, %v1028_v52  ;;  %v1035_v21 = vmul.f32 %v1028_v52, %v3121_v43  ;;  %v3760_v52 = vld [vmem:[#allocation45_spill] sm:$0xff] }
 0x145   : > { %v1034_v29 = vmul.f32 %v2401_v49, %v1033_v12  ;;  %1295 = vmatpush.bf16.msrb.mxu2 %v3099_v17  ;;  %v3761_v49 = vld [vmem:[#allocation46_spill] sm:$0xff] }
 0x146   : > { %1374 = vmatpush.bf16.msrb.mxu3 %v3065_v38  ;;  %1387 = vmatpush.bf16.msra.mxu0 %v3174_v45 }
 0x147   : > { %v1036_v36 = vadd.f32 %v1035_v21, %v1034_v29 }
 0x149   : > { %v3362_v51 = vsel %vm1043_vm7, %v1036_v36, %v3121_v43  ;;  %v1045_v35 = vsel %vm1043_vm7, %v1036_v36, 0.0  ;;  %1296 = vmatpush.bf16.msrb.mxu2 %v3113_v40  ;;  %v3745_v43 = vld [vmem:[#allocation30_spill] sm:$0xff] }
 0x14a   : > { %2154 = vst [vmem:[%s3033_s3 + $0x18] sm:$0xff] %v1045_v35  ;;  %v1160_v6 = vpack.c.bf16 %v3362_v51, %v3362_v51  ;;  %1375 = vmatpush.bf16.msrb.mxu3 %v3077_v50  ;;  %1388 = vmatpush.bf16.msra.mxu0 %v3185_v63 }
 0x14c   : > { %1169 = vmatmul.bf16.vlgmr.msra.gmra.mxu1 %v1160_v6  ;;  %1182 = vmatmul.bf16.vlgmr.msra.gmra.mxu2 %v1160_v6 }
 0x14d   : > { %1195 = vmatmul.bf16.vlgmr.msra.gmra.mxu3 %v1160_v6  ;;  %1397 = vmatpush.bf16.msra.mxu1 %v3129_v54 }
 0x14e   : > { %1297 = vmatpush.bf16.msrb.mxu2 %v3140_v59  ;;  %1376 = vmatpush.bf16.msrb.mxu3 %v3091_v2 }
 0x14f   : > { %1389 = vmatpush.bf16.msra.mxu0 %v3195_v25 }
 0x151   : > { %1398 = vmatpush.bf16.msra.mxu1 %v3151_v8 }
 0x152   : > { %1298 = vmatpush.bf16.msrb.mxu2 %v3156_v15  ;;  %1377 = vmatpush.bf16.msrb.mxu3 %v3103_v20 }
 0x153   : > { %1390 = vmatpush.bf16.msra.mxu0 %v3204_v37 }
 0x155   : > { %1399 = vmatpush.bf16.msra.mxu1 %v3167_v31 }
 0x156   : > { %1299 = vmatpush.bf16.msrb.mxu2 %v3170_v44  ;;  %1378 = vmatpush.bf16.msrb.mxu3 %v3117_v41 }
 0x157   : > { %1391 = vmatpush.bf16.msra.mxu0 %v3213_v7 }
 0x159   : > { %1400 = vmatpush.bf16.msra.mxu1 %v3180_v57 }
 0x15a   : > { %1476 = vmatpush.bf16.msra.mxu2 %v3036_v5  ;;  %1489 = vmatpush.bf16.msra.mxu3 %v3040_v10  ;;  %v3749_v5 = vld [vmem:[#allocation33_spill] sm:$0xff]  ;;  %v3750_v10 = vld [vmem:[#allocation43_spill] sm:$0xff] }
 0x15d   : > { %1401 = vmatpush.bf16.msra.mxu1 %v3191_v11 }
 0x15e   : > { %1477 = vmatpush.bf16.msra.mxu2 %v3043_v14  ;;  %1490 = vmatpush.bf16.msra.mxu3 %v3049_v19  ;;  %v3752_v14 = vld [vmem:[#allocation35_spill] sm:$0xff]  ;;  %v3753_v19 = vld [vmem:[#allocation44_spill] sm:$0xff] }
 0x161   : > { %1402 = vmatpush.bf16.msra.mxu1 %v3747_v26 }
 0x162   : > { %1478 = vmatpush.bf16.msra.mxu2 %v3745_v43  ;;  %1491 = vmatpush.bf16.msra.mxu3 %v3746_v58 }
 0x165   : > { %1403 = vmatpush.bf16.msra.mxu1 %v3750_v10 }
 0x166   : > { %1479 = vmatpush.bf16.msra.mxu2 %v3748_v28  ;;  %1492 = vmatpush.bf16.msra.mxu3 %v3749_v5  ;;  %v2160_v28 = vld [vmem:[%s3011_s23 + $0x18] sm:$0xff] }
 0x169   : > { %1404 = vmatpush.bf16.msra.mxu1 %v3753_v19 }
 0x16a   : > { %1480 = vmatpush.bf16.msra.mxu2 %v3751_v39  ;;  %1493 = vmatpush.bf16.msra.mxu3 %v3752_v14  ;;  %v1157_v39 = vunpack.c.l.bf16 %v2160_v28 }
 0x16e   : > { %1481 = vmatpush.bf16.msra.mxu2 %v3754_v48  ;;  %1494 = vmatpush.bf16.msra.mxu3 %v3755_v22 }
 0x172   : > { %1482 = vmatpush.bf16.msra.mxu2 %v3756_v47  ;;  %1495 = vmatpush.bf16.msra.mxu3 %v3757_v32  ;;  %v3762_v32 = vld [vmem:[#allocation47_spill] sm:$0xff] }
 0x176   : > { %1483 = vmatpush.bf16.msra.mxu2 %v3758_v34  ;;  %1496 = vmatpush.bf16.msra.mxu3 %v3759_v4 }
 0x1b6   : > { %v1091_v61 = vpop.f32.mrf.mxu0 }
 0x1bb   : > { %v1065_v53 = vpop.f32.mrf.mxu2  ;;  %v1078_v16 = vpop.f32.mrf.mxu3 }
 0x1bc   : > { %v1066_v12 = vadd.f32 %v1065_v53, %v3760_v52  ;;  %v1079_v29 = vadd.f32 %v1078_v16, %v3761_v49  ;;  %v3763_v53 = vld [vmem:[#allocation49_spill] sm:$0xff] }
 0x1be   : > { %v1095_v21 = vadd.f32 %v1066_v12, %v1052_v3  ;;  %v1115_v33 = vadd.f32 %v1079_v29, %v1053_v30  ;;  %v1093_v36 = vpop.f32.mrf.mxu0  ;;  %v1158_v3 = vunpack.c.h.bf16 %v2160_v28 }
 0x1c0   : > { %v2157_v35 = vmul.f32 -1.442695, %v1095_v21  ;;  %v2158_v6 = vmul.f32 -1.442695, %v1115_v33 }
 0x1c2   : > { %2402 = vpow2.f32 %v2157_v35 }
 0x1c3   : > { %2404 = vpow2.f32 %v2158_v6  ;;  %v1067_v43 = vpop.f32.mrf.mxu2  ;;  %v1080_v58 = vpop.f32.mrf.mxu3 }
 0x1c8   : > { %v2403_v5 = vpop.eup %2402 }
 0x1c9   : > { %v2405_v14 = vpop.eup %2404  ;;  %v1099_v48 = vadd.f32 1.0, %v2403_v5  ;;  %v1170_v22 = vpop.f32.mrf.mxu1 }
 0x1ca   : > { %v1119_v47 = vadd.f32 1.0, %v2405_v14  ;;  %v1171_v34 = vadd.f32 %v1170_v22, %v3762_v32 }
 0x1cb   : > { %2406 = vrcp.f32 %v1099_v48  ;;  %v1111_v5 = vand.u32 2147483648, %v1099_v48  ;;  %v1109_v28 = vand.u32 2147483647, %v1099_v48  ;;  %vm1105_vm9 = vweird.f32 %v1099_v48 }
 0x1cc   : > { %2408 = vrcp.f32 %v1119_v47  ;;  %v1200_v4 = vadd.f32 %v1171_v34, %v1157_v39  ;;  %vm1125_vm13 = vweird.f32 %v1119_v47 }
 0x1cd   : > { %vm1110_vm11 = vcmp.eq.f32.partialorder %v1109_v28, 8.507059e+37 }
 0x1ce   : > { %v2162_v56 = vmul.f32 -1.442695, %v1200_v4 }
 0x1cf   : > { %v1183_v30 = vpop.f32.mrf.mxu2 }
 0x1d0   : > { %2410 = vpow2.f32 %v2162_v56  ;;  %v1184_v16 = vadd.f32 %v1183_v30, %v3763_v53  ;;  %v3409_v12 = vpop.f32.mrf.mxu3  ;;  %v2156_v56 = vld [vmem:[%s3001_s28 + $0x14] sm:$0xf] }
 0x1d1   : > { %v2407_v29 = vpop.eup %2406  ;;  %v1172_v21 = vpop.f32.mrf.mxu1 }
 0x1d2   : > { %v2409_v33 = vpop.eup %2408  ;;  %v1101_v36 = vmul.f32 %v2407_v29, %v1099_v48  ;;  %v1220_v35 = vadd.f32 %v1184_v16, %v1158_v3  ;;  %vm1106_vm8 = vweird.f32 %v2407_v29  ;;  %v1112_v3 = vor.u32 1.1754944e-38, %v1111_v5  ;;  %v3764_v16 = vld [vmem:[#allocation48_spill] sm:$0xff] }
 0x1d3   : > { %v1121_v6 = vmul.f32 %v2409_v33, %v1119_v47  ;;  %vm1107_vm10 = vmor %vm1105_vm9, %vm1106_vm8  ;;  %vm1126_vm12 = vweird.f32 %v2409_v33  ;;  %v1129_v48 = vand.u32 2147483647, %v1119_v47  ;;  %v1352_v5 = vstv %s1258_s5 }
 0x1d4   : > { %v1102_v43 = vsub.f32 1.0, %v1101_v36  ;;  %v2163_v58 = vmul.f32 -1.442695, %v1220_v35  ;;  %v1092_v36 = vadd.f32 %v1091_v61, %v3764_v16  ;;  %v1054_v35 = vunpack.c.l.bf16 %v2156_v56  ;;  %vm3419_vm14 = vmor %vm1125_vm13, %vm1126_vm12 }
 0x1d5   : > { %v1122_v14 = vsub.f32 1.0, %v1121_v6  ;;  %vm1353_vm15 = vcmp.lt.s32.totalorder %v1352_v5, %v3029_v0  ;;  %vm1130_vm0 = vcmp.eq.f32.partialorder %v1129_v48, 8.507059e+37 }
 0x1d6   : > { %v2411_v39 = vpop.eup %2410  ;;  %v1103_v22 = vmul.f32 %v2407_v29, %v1102_v43  ;;  %2412 = vpow2.f32 %v2163_v58 }
 0x1d7   : > { %v3411_v34 = vadd.f32 1.0, %v2411_v39  ;;  %v1185_v4 = vpop.f32.mrf.mxu2  ;;  %v1123_v30 = vmul.f32 %v2409_v33, %v1122_v14 }
 0x1d8   : > { %v1104_v21 = vadd.f32 %v2407_v29, %v1103_v22  ;;  %v1198_v32 = vpop.f32.mrf.mxu3  ;;  %v1131_v4 = vand.u32 2147483648, %v1119_v47  ;;  %v1354_v47 = vsel %vm1353_vm15, 1, %v3744_v24 }
 0x1d9   : > { %2414 = vrcp.f32 %v3411_v34  ;;  %v1124_v58 = vadd.f32 %v2409_v33, %v1123_v30  ;;  %1356 = vperm.xlu2 %2381, %v1354_v47   ;;  %vm1210_vm3 = vweird.f32 %v3411_v34 }
 0x1da   : > { %v1108_v6 = vsel %vm1107_vm10, %v2407_v29, %v1104_v21  ;;  %v1132_v30 = vor.u32 1.1754944e-38, %v1131_v4  ;;  %v1457_v21 = vstv %s1363_s12  ;;  %v1147_v4 = vpop.permute.xlu1 %1146 }
 0x1db   : > { %v1113_v43 = vsel %vm1110_vm11, %v1112_v3, %v1108_v6  ;;  %v1128_v28 = vsel %vm3419_vm14, %v2409_v33, %v1124_v58  ;;  %v2161_v3 = vld [vmem:[%s3011_s23 + $0x20] sm:$0xf]  ;;  %v1216_v6 = vand.u32 2147483648, %v3411_v34  ;;  %v1214_v33 = vand.u32 2147483647, %v3411_v34 }
 0x1dc   : > { %v2413_v39 = vpop.eup %2412  ;;  %v1135_v14 = vmul.f32 %v1113_v43, %v1092_v36  ;;  %vm1458_vm2 = vcmp.lt.s32.totalorder %v1457_v21, %v3029_v0  ;;  %vm1148_vm4 = vcmp.eq.s32.totalorder %v1147_v4, 1  ;;  %v1197_v0 = vadd.f32 %v3409_v12, %v3327_v13 }
 0x1dd   : > { %v3417_v22 = vadd.f32 1.0, %v2413_v39  ;;  %v1159_v39 = vunpack.c.l.bf16 %v2161_v3  ;;  %v1217_v5 = vor.u32 1.1754944e-38, %v1216_v6  ;;  %vm1215_vm6 = vcmp.eq.f32.partialorder %v1214_v33, 8.507059e+37 }
 0x1de   : > { %v1136_v61 = vadd.f32 %v1135_v14, %v1054_v35  ;;  %v1133_v35 = vsel %vm1130_vm0, %v1132_v30, %v1128_v28  ;;  %v1459_v30 = vsel %vm1458_vm2, 1, %v3744_v24 }
 0x1df   : > { %v2415_v29 = vpop.eup %2414  ;;  %2416 = vrcp.f32 %v3417_v22  ;;  %v1138_v14 = vsub.f32 1.0, %v1133_v35  ;;  %v1236_v16 = vand.u32 2147483648, %v3417_v22  ;;  %v1234_v6 = vand.u32 2147483647, %v3417_v22 }
 0x1e0   : > { %v1206_v56 = vmul.f32 %v2415_v29, %v3411_v34  ;;  %2418 = vtanh.f32 %v1136_v61  ;;  %vm1211_vm1 = vweird.f32 %v2415_v29  ;;  %vm1230_vm8 = vweird.f32 %v3417_v22 }
 0x1e1   : > { %vm1212_vm5 = vmor %vm1210_vm3, %vm1211_vm1  ;;  %1461 = vperm.xlu2 %2381, %v1459_v30   ;;  %vm1235_vm10 = vcmp.eq.f32.partialorder %v1234_v6, 8.507059e+37  ;;  %v2166_v6 = vld [vmem:[%s3001_s28 + $0x20] sm:$0xf] }
 0x1e2   : > { %v1207_v36 = vsub.f32 1.0, %v1206_v56  ;;  %v1140_v56 = vmul.f32 %v1133_v35, %v3339_v62  ;;  %v1252_v4 = vpop.permute.xlu1 %1251 }
 0x1e3   : > { %vm1253_vm11 = vcmp.eq.s32.totalorder %v1252_v4, 1 }
 0x1e4   : > { %v1208_v43 = vmul.f32 %v2415_v29, %v1207_v36 }
 0x1e5   : > { %v2417_v58 = vpop.eup %2416 }
 0x1e6   : > { %v2419_v48 = vpop.eup %2418  ;;  %v1209_v32 = vadd.f32 %v2415_v29, %v1208_v43  ;;  %v1226_v61 = vmul.f32 %v2417_v58, %v3417_v22  ;;  %vm1231_vm7 = vweird.f32 %v2417_v58 }
 0x1e7   : > { %v1139_v28 = vmul.f32 %v2419_v48, %v1138_v14  ;;  %vm1232_vm9 = vmor %vm1230_vm8, %vm1231_vm7  ;;  %v1237_v48 = vor.u32 1.1754944e-38, %v1236_v16 }
 0x1e8   : > { %v1213_v47 = vsel %vm1212_vm5, %v2415_v29, %v1209_v32  ;;  %v1227_v21 = vsub.f32 1.0, %v1226_v61 }
 0x1e9   : > { %v1218_v3 = vsel %vm1215_vm6, %v1217_v5, %v1213_v47  ;;  %v1141_v36 = vadd.f32 %v1140_v56, %v1139_v28 }
 0x1ea   : > { %v1240_v34 = vmul.f32 %v1218_v3, %v1197_v0  ;;  %v1228_v43 = vmul.f32 %v2417_v58, %v1227_v21 }
 0x1eb   : > { %v3443_v35 = vsel %vm1148_vm4, %v1141_v36, %v3339_v62  ;;  %v1150_v24 = vsel %vm1148_vm4, %v1141_v36, 0.0 }
 0x1ec   : > { %v1241_v12 = vadd.f32 %v1240_v34, %v1159_v39  ;;  %2159 = vst [vmem:[%s3031_s19 + $0x8] sm:$0xff] %v1150_v24  ;;  %v1265_v29 = vpack.c.bf16 %v3443_v35, %v3443_v35  ;;  %v1229_v33 = vadd.f32 %v2417_v58, %v1228_v43 }
 0x1ee   : > { %2420 = vtanh.f32 %v1241_v12  ;;  %v1233_v14 = vsel %vm1232_vm9, %v2417_v58, %v1229_v33  ;;  %1274 = vmatmul.bf16.vlgmr.msrb.gmra.mxu0 %v1265_v29  ;;  %1287 = vmatmul.bf16.vlgmr.msrb.gmra.mxu1 %v1265_v29 }
 0x1ef   : > { %1300 = vmatmul.bf16.vlgmr.msrb.gmra.mxu2 %v1265_v29  ;;  %1502 = vmatpush.bf16.msrb.mxu0 %v3069_v46  ;;  %v1238_v62 = vsel %vm1235_vm10, %v1237_v48, %v1233_v14 }
 0x1f0   : > { %1580 = vmatpush.bf16.msrb.mxu1 %v3038_v9  ;;  %1593 = vmatpush.bf16.msrb.mxu2 %v3119_v42  ;;  %v1243_v39 = vsub.f32 1.0, %v1238_v62  ;;  %v1245_v58 = vmul.f32 %v1238_v62, %v3362_v51 }
 0x1f3   : > { %1503 = vmatpush.bf16.msrb.mxu0 %v3081_v55 }
 0x1f4   : > { %v2421_v22 = vpop.eup %2420  ;;  %1581 = vmatpush.bf16.msrb.mxu1 %v3047_v18  ;;  %1594 = vmatpush.bf16.msrb.mxu2 %v3144_v60 }
 0x1f5   : > { %v1244_v16 = vmul.f32 %v2421_v22, %v1243_v39  ;;  %v1264_v39 = vunpack.c.l.bf16 %v2166_v6  ;;  %v3768_v22 = vld [vmem:[#allocation48_spill] sm:$0xff] }
 0x1f7   : > { %v1246_v32 = vadd.f32 %v1245_v58, %v1244_v16  ;;  %1504 = vmatpush.bf16.msrb.mxu0 %v3087_v1 }
 0x1f8   : > { %1582 = vmatpush.bf16.msrb.mxu1 %v3056_v27  ;;  %1595 = vmatpush.bf16.msrb.mxu2 %v3162_v23  ;;  %v2165_v27 = vld [vmem:[%s3001_s28 + $0x18] sm:$0xff] }
 0x1f9   : > { %v3462_v9 = vsel %vm1253_vm11, %v1246_v32, %v3362_v51  ;;  %v1255_v46 = vsel %vm1253_vm11, %v1246_v32, 0.0 }
 0x1fa   : > { %2164 = vst [vmem:[%s3033_s3 + $0x10] sm:$0xff] %v1255_v46  ;;  %v1370_v18 = vpack.c.bf16 %v3462_v9, %v3462_v9 }
 0x1fb   : > { %1505 = vmatpush.bf16.msrb.mxu0 %v3099_v17 }
 0x1fc   : > { %1379 = vmatmul.bf16.vlgmr.msrb.gmra.mxu3 %v1370_v18  ;;  %1583 = vmatpush.bf16.msrb.mxu1 %v3065_v38  ;;  %v1262_v38 = vunpack.c.l.bf16 %v2165_v27 }
 0x1fd   : > { %1606 = vmatpush.bf16.msrb.mxu3 %v3129_v54  ;;  %1596 = vmatpush.bf16.msrb.mxu2 %v3174_v45 }
 0x1fe   : > { %1392 = vmatmul.bf16.vlgmr.msra.gmra.mxu0 %v1370_v18  ;;  %1405 = vmatmul.bf16.vlgmr.msra.gmra.mxu1 %v1370_v18 }
 0x1ff   : > { %1506 = vmatpush.bf16.msrb.mxu0 %v3113_v40 }
 0x200   : > { %1584 = vmatpush.bf16.msrb.mxu1 %v3077_v50  ;;  %v1263_v50 = vunpack.c.h.bf16 %v2165_v27 }
 0x201   : > { %1607 = vmatpush.bf16.msrb.mxu3 %v3151_v8  ;;  %1597 = vmatpush.bf16.msrb.mxu2 %v3185_v63  ;;  %v2170_v8 = vld [vmem:[%s3011_s23 + $0xc] sm:$0xff] }
 0x203   : > { %1507 = vmatpush.bf16.msrb.mxu0 %v3140_v59 }
 0x204   : > { %1585 = vmatpush.bf16.msrb.mxu1 %v3091_v2 }
 0x205   : > { %1608 = vmatpush.bf16.msrb.mxu3 %v3167_v31  ;;  %1598 = vmatpush.bf16.msrb.mxu2 %v3195_v25 }
 0x207   : > { %1508 = vmatpush.bf16.msrb.mxu0 %v3156_v15 }
 0x208   : > { %1586 = vmatpush.bf16.msrb.mxu1 %v3103_v20 }
 0x209   : > { %1609 = vmatpush.bf16.msrb.mxu3 %v3180_v57  ;;  %1599 = vmatpush.bf16.msrb.mxu2 %v3204_v37  ;;  %v1368_v57 = vunpack.c.h.bf16 %v2170_v8 }
 0x20b   : > { %1509 = vmatpush.bf16.msrb.mxu0 %v3170_v44 }
 0x20c   : > { %1587 = vmatpush.bf16.msrb.mxu1 %v3117_v41 }
 0x20d   : > { %1610 = vmatpush.bf16.msrb.mxu3 %v3191_v11  ;;  %1600 = vmatpush.bf16.msrb.mxu2 %v3213_v7  ;;  %v1367_v7 = vunpack.c.l.bf16 %v2170_v8 }
 0x211   : > { %1611 = vmatpush.bf16.msrb.mxu3 %v3747_v26 }
 0x215   : > { %1612 = vmatpush.bf16.msrb.mxu3 %v3750_v10  ;;  %v3767_v10 = vld [vmem:[#allocation47_spill] sm:$0xff] }
 0x219   : > { %1613 = vmatpush.bf16.msrb.mxu3 %v3753_v19 }
 0x26b   : > { %v1275_v55 = vpop.f32.mrf.mxu0  ;;  %v1288_v1 = vpop.f32.mrf.mxu1 }
 0x26c   : > { %v1276_v2 = vadd.f32 %v1275_v55, %v3760_v52  ;;  %v1289_v17 = vadd.f32 %v1288_v1, %v3761_v49 }
 0x26e   : > { %v1305_v20 = vadd.f32 %v1276_v2, %v1262_v38  ;;  %v1325_v40 = vadd.f32 %v1289_v17, %v1263_v50 }
 0x270   : > { %v2167_v41 = vmul.f32 -1.442695, %v1305_v20  ;;  %v2168_v42 = vmul.f32 -1.442695, %v1325_v40 }
 0x272   : > { %2422 = vpow2.f32 %v2167_v41  ;;  %v1301_v54 = vpop.f32.mrf.mxu2 }
 0x273   : > { %2424 = vpow2.f32 %v2168_v42  ;;  %v1277_v59 = vpop.f32.mrf.mxu0  ;;  %v1290_v60 = vpop.f32.mrf.mxu1  ;;  %v1302_v16 = vadd.f32 %v1301_v54, %v3768_v22 }
 0x274   : > { %v1357_v42 = vpop.permute.xlu2 %1356 }
 0x275   : > { %vm1358_vm4 = vcmp.eq.s32.totalorder %v1357_v42, 1 }
 0x278   : > { %v2423_v15 = vpop.eup %2422 }
 0x279   : > { %v2425_v23 = vpop.eup %2424  ;;  %v1309_v31 = vadd.f32 1.0, %v2423_v15 }
 0x27a   : > { %v1329_v44 = vadd.f32 1.0, %v2425_v23  ;;  %v1303_v45 = vpop.f32.mrf.mxu2 }
 0x27b   : > { %2426 = vrcp.f32 %v1309_v31  ;;  %v1393_v63 = vpop.f32.mrf.mxu0  ;;  %v3494_v11 = vpop.f32.mrf.mxu1  ;;  %v1321_v36 = vand.u32 2147483648, %v1309_v31  ;;  %v1319_v24 = vand.u32 2147483647, %v1309_v31  ;;  %vm1315_vm13 = vweird.f32 %v1309_v31 }
 0x27c   : > { %2428 = vrcp.f32 %v1329_v44  ;;  %v1394_v25 = vadd.f32 %v1393_v63, %v3763_v53  ;;  %v1341_v27 = vand.u32 2147483648, %v1329_v44  ;;  %vm1335_vm1 = vweird.f32 %v1329_v44  ;;  %v1462_v6 = vpop.permute.xlu2 %1461 }
 0x27d   : > { %v1322_v48 = vor.u32 1.1754944e-38, %v1321_v36  ;;  %vm1320_vm15 = vcmp.eq.f32.partialorder %v1319_v24, 8.507059e+37  ;;  %v1339_v50 = vand.u32 2147483647, %v1329_v44 }
 0x27e   : > { %v1430_v37 = vadd.f32 %v1394_v25, %v1368_v57  ;;  %v1342_v2 = vor.u32 1.1754944e-38, %v1341_v27 }
 0x27f   : > { %v1380_v51 = vpop.f32.mrf.mxu3  ;;  %vm1340_vm3 = vcmp.eq.f32.partialorder %v1339_v50, 8.507059e+37 }
 0x280   : > { %v2173_v26 = vmul.f32 -1.442695, %v1430_v37  ;;  %v1381_v19 = vadd.f32 %v1380_v51, %v3767_v10 }
 0x281   : > { %v2427_v61 = vpop.eup %2426 }
 0x282   : > { %v2429_v5 = vpop.eup %2428  ;;  %v1311_v28 = vmul.f32 %v2427_v61, %v1309_v31  ;;  %2430 = vpow2.f32 %v2173_v26  ;;  %v1410_v56 = vadd.f32 %v1381_v19, %v1367_v7  ;;  %vm1316_vm12 = vweird.f32 %v2427_v61  ;;  %v2171_v7 = vld [vmem:[%s3011_s23 + $0x14] sm:$0xf] }
 0x283   : > { %v1395_v30 = vpop.f32.mrf.mxu0  ;;  %v1408_v0 = vpop.f32.mrf.mxu1  ;;  %v1331_v47 = vmul.f32 %v2429_v5, %v1329_v44  ;;  %vm1317_vm14 = vmor %vm1315_vm13, %vm1316_vm12  ;;  %vm1336_vm0 = vweird.f32 %v2429_v5  ;;  %vm1463_vm13 = vcmp.eq.s32.totalorder %v1462_v6, 1 }
 0x284   : > { %v1312_v21 = vsub.f32 1.0, %v1311_v28  ;;  %v2172_v3 = vmul.f32 -1.442695, %v1410_v56  ;;  %vm1337_vm2 = vmor %vm1335_vm1, %vm1336_vm0  ;;  %v1369_v28 = vunpack.c.l.bf16 %v2171_v7 }
 0x285   : > { %v1332_v34 = vsub.f32 1.0, %v1331_v47 }
 0x286   : > { %v1313_v43 = vmul.f32 %v2427_v61, %v1312_v21  ;;  %2432 = vpow2.f32 %v2172_v3 }
 0x287   : > { %v1382_v12 = vpop.f32.mrf.mxu3  ;;  %v1333_v29 = vmul.f32 %v2429_v5, %v1332_v34 }
 0x288   : > { %v2431_v33 = vpop.eup %2430  ;;  %v1314_v14 = vadd.f32 %v2427_v61, %v1313_v43 }
 0x289   : > { %v3499_v62 = vadd.f32 1.0, %v2431_v33  ;;  %v1334_v32 = vadd.f32 %v2429_v5, %v1333_v29 }
 0x28a   : > { %v1318_v58 = vsel %vm1317_vm14, %v2427_v61, %v1314_v14 }
 0x28b   : > { %v1323_v4 = vsel %vm1320_vm15, %v1322_v48, %v1318_v58  ;;  %2434 = vrcp.f32 %v3499_v62  ;;  %v1338_v1 = vsel %vm1337_vm2, %v2429_v5, %v1334_v32  ;;  %v1407_v5 = vadd.f32 %v3494_v11, %v3327_v13 }
 0x28c   : > { %v2433_v46 = vpop.eup %2432  ;;  %v1345_v18 = vmul.f32 %v1323_v4, %v1302_v16  ;;  %v1343_v20 = vsel %vm1340_vm3, %v1342_v2, %v1338_v1  ;;  %v1446_v0 = vand.u32 2147483648, %v3499_v62  ;;  %vm1440_vm10 = vweird.f32 %v3499_v62  ;;  %v2175_v16 = vld [vmem:[%s3001_s28 + $0x24] sm:$0xff] }
 0x28d   : > { %v1414_v38 = vadd.f32 1.0, %v2433_v46  ;;  %v1348_v54 = vsub.f32 1.0, %v1343_v20  ;;  %v1350_v15 = vmul.f32 %v1343_v20, %v3443_v35  ;;  %v1444_v21 = vand.u32 2147483647, %v3499_v62  ;;  %v1574_v20 = vld [vmem:[%s3011_s23] sm:$0xff] }
 0x28e   : > { %v1346_v55 = vadd.f32 %v1345_v18, %v1264_v39  ;;  %v1447_v36 = vor.u32 1.1754944e-38, %v1446_v0  ;;  %v1472_v58 = vunpack.c.l.bf16 %v2175_v16  ;;  %v1473_v4 = vunpack.c.h.bf16 %v2175_v16 }
 0x28f   : > { %2436 = vrcp.f32 %v1414_v38  ;;  %v1426_v44 = vand.u32 2147483648, %v1414_v38  ;;  %v1424_v63 = vand.u32 2147483647, %v1414_v38  ;;  %vm1420_vm6 = vweird.f32 %v1414_v38 }
 0x290   : > { %2438 = vtanh.f32 %v1346_v55  ;;  %vm1445_vm12 = vcmp.eq.f32.partialorder %v1444_v21, 8.507059e+37 }
 0x291   : > { %v2435_v17 = vpop.eup %2434  ;;  %v1427_v61 = vor.u32 1.1754944e-38, %v1426_v44  ;;  %vm1425_vm8 = vcmp.eq.f32.partialorder %v1424_v63, 8.507059e+37 }
 0x292   : > { %v1436_v40 = vmul.f32 %v2435_v17, %v3499_v62  ;;  %vm1441_vm9 = vweird.f32 %v2435_v17 }
 0x293   : > { %vm1442_vm11 = vmor %vm1440_vm10, %vm1441_vm9 }
 0x294   : > { %v1437_v23 = vsub.f32 1.0, %v1436_v40 }
 0x295   : > { %v2437_v41 = vpop.eup %2436 }
 0x296   : > { %v2439_v59 = vpop.eup %2438  ;;  %v1416_v60 = vmul.f32 %v2437_v41, %v1414_v38  ;;  %vm1421_vm5 = vweird.f32 %v2437_v41  ;;  %v1438_v51 = vmul.f32 %v2435_v17, %v1437_v23 }
 0x297   : > { %v1349_v8 = vmul.f32 %v2439_v59, %v1348_v54  ;;  %vm1422_vm7 = vmor %vm1420_vm6, %vm1421_vm5  ;;  %v1576_v54 = vunpack.c.l.bf16 %v1574_v20 }
 0x298   : > { %v1417_v31 = vsub.f32 1.0, %v1416_v60  ;;  %v1439_v30 = vadd.f32 %v2435_v17, %v1438_v51 }
 0x299   : > { %v1351_v45 = vadd.f32 %v1350_v15, %v1349_v8  ;;  %v1577_v8 = vunpack.c.h.bf16 %v1574_v20 }
 0x29a   : > { %v1418_v57 = vmul.f32 %v2437_v41, %v1417_v31  ;;  %v1443_v11 = vsel %vm1442_vm11, %v2435_v17, %v1439_v30 }
 0x29b   : > { %v3506_v25 = vsel %vm1358_vm4, %v1351_v45, %v3443_v35  ;;  %v1360_v37 = vsel %vm1358_vm4, %v1351_v45, 0.0  ;;  %v1448_v34 = vsel %vm1445_vm12, %v1447_v36, %v1443_v11 }
 0x29c   : > { %2169 = vst [vmem:[%s3031_s19 + $0x10] sm:$0xff] %v1360_v37  ;;  %v1475_v26 = vpack.c.bf16 %v3506_v25, %v3506_v25  ;;  %v1419_v19 = vadd.f32 %v2437_v41, %v1418_v57  ;;  %v1453_v43 = vsub.f32 1.0, %v1448_v34  ;;  %v1455_v29 = vmul.f32 %v1448_v34, %v3462_v9 }
 0x29e   : > { %1484 = vmatmul.bf16.vlgmr.msra.gmra.mxu2 %v1475_v26  ;;  %1497 = vmatmul.bf16.vlgmr.msra.gmra.mxu3 %v1475_v26  ;;  %v1423_v56 = vsel %vm1422_vm7, %v2437_v41, %v1419_v19 }
 0x29f   : > { %1510 = vmatmul.bf16.vlgmr.msrb.gmra.mxu0 %v1475_v26  ;;  %v1428_v35 = vsel %vm1425_vm8, %v1427_v61, %v1423_v56 }
 0x2a0   : > { %v1450_v47 = vmul.f32 %v1428_v35, %v1407_v5  ;;  %v2176_v5 = vld [vmem:[%s3001_s28 + $0x2c] sm:$0xf] }
 0x2a2   : > { %v1451_v3 = vadd.f32 %v1450_v47, %v1369_v28 }
 0x2a4   : > { %2440 = vtanh.f32 %v1451_v3  ;;  %v1474_v3 = vunpack.c.l.bf16 %v2176_v5 }
 0x2aa   : > { %v2441_v24 = vpop.eup %2440 }
 0x2ab   : > { %v1454_v12 = vmul.f32 %v2441_v24, %v1453_v43 }
 0x2ad   : > { %v1456_v33 = vadd.f32 %v1455_v29, %v1454_v12 }
 0x2af   : > { %v3519_v14 = vsel %vm1463_vm13, %v1456_v33, %v3462_v9  ;;  %v1465_v48 = vsel %vm1463_vm13, %v1456_v33, 0.0 }
 0x2b0   : > { %2174 = vst [vmem:[%s3033_s3 + $0x8] sm:$0xff] %v1465_v48  ;;  %v1579_v62 = vpack.c.bf16 %v3519_v14, %v3519_v14 }
 0x2b2   : > { %1588 = vmatmul.bf16.vlgmr.msrb.gmra.mxu1 %v1579_v62  ;;  %1601 = vmatmul.bf16.vlgmr.msrb.gmra.mxu2 %v1579_v62 }
 0x2b3   : > { %1614 = vmatmul.bf16.vlgmr.msrb.gmra.mxu3 %v1579_v62 }
 0x31c   : > { %v1511_v39 = vpop.f32.mrf.mxu0 }
 0x31d   : > { %v1512_v36 = vadd.f32 %v1511_v39, %v3768_v22 }
 0x321   : > { %v1485_v32 = vpop.f32.mrf.mxu2  ;;  %v1498_v46 = vpop.f32.mrf.mxu3 }
 0x322   : > { %v1486_v18 = vadd.f32 %v1485_v32, %v3760_v52  ;;  %v1499_v9 = vadd.f32 %v1498_v46, %v3761_v49 }
 0x324   : > { %v1515_v27 = vadd.f32 %v1486_v18, %v1472_v58  ;;  %v1535_v38 = vadd.f32 %v1499_v9, %v1473_v4  ;;  %v1513_v50 = vpop.f32.mrf.mxu0 }
 0x326   : > { %v2177_v55 = vmul.f32 -1.442695, %v1515_v27  ;;  %v2178_v1 = vmul.f32 -1.442695, %v1535_v38  ;;  %v1575_v27 = vld [vmem:[%s3011_s23 + $0x8] sm:$0xf] }
 0x328   : > { %2442 = vpow2.f32 %v2177_v55 }
 0x329   : > { %2444 = vpow2.f32 %v2178_v1  ;;  %v1487_v2 = vpop.f32.mrf.mxu2  ;;  %v1500_v17 = vpop.f32.mrf.mxu3 }
 0x32a   : > { %v1567_v2 = vpop.permute.xlu0 %1566 }
 0x32b   : > { %vm1568_vm10 = vcmp.eq.s32.totalorder %v1567_v2, 1 }
 0x32e   : > { %v2443_v40 = vpop.eup %2442 }
 0x32f   : > { %v2445_v41 = vpop.eup %2444  ;;  %v1519_v42 = vadd.f32 1.0, %v2443_v40  ;;  %v1589_v59 = vpop.f32.mrf.mxu1 }
 0x330   : > { %v1539_v60 = vadd.f32 1.0, %v2445_v41  ;;  %v1590_v52 = vadd.f32 %v1589_v59, %v3767_v10 }
 0x331   : > { %2446 = vrcp.f32 %v1519_v42  ;;  %v1531_v19 = vand.u32 2147483648, %v1519_v42  ;;  %v1529_v56 = vand.u32 2147483647, %v1519_v42  ;;  %vm1525_vm15 = vweird.f32 %v1519_v42 }
 0x332   : > { %2448 = vrcp.f32 %v1539_v60  ;;  %v1619_v49 = vadd.f32 %v1590_v52, %v1576_v54  ;;  %v1551_v29 = vand.u32 2147483648, %v1539_v60  ;;  %vm1545_vm3 = vweird.f32 %v1539_v60 }
 0x333   : > { %v1532_v11 = vor.u32 1.1754944e-38, %v1531_v19  ;;  %vm1530_vm1 = vcmp.eq.f32.partialorder %v1529_v56, 8.507059e+37  ;;  %v1549_v33 = vand.u32 2147483647, %v1539_v60 }
 0x334   : > { %v2180_v15 = vmul.f32 -1.442695, %v1619_v49  ;;  %v1552_v22 = vor.u32 1.1754944e-38, %v1551_v29 }
 0x335   : > { %v1602_v23 = vpop.f32.mrf.mxu2  ;;  %vm1550_vm5 = vcmp.eq.f32.partialorder %v1549_v33, 8.507059e+37 }
 0x336   : > { %v1603_v31 = vadd.f32 %v1602_v23, %v3763_v53  ;;  %v3530_v44 = vpop.f32.mrf.mxu3  ;;  %2450 = vpow2.f32 %v2180_v15 }
 0x337   : > { %v2447_v45 = vpop.eup %2446  ;;  %v1591_v57 = vpop.f32.mrf.mxu1 }
 0x338   : > { %v2449_v63 = vpop.eup %2448  ;;  %v1521_v37 = vmul.f32 %v2447_v45, %v1519_v42  ;;  %v1639_v7 = vadd.f32 %v1603_v31, %v1577_v8  ;;  %vm1526_vm14 = vweird.f32 %v2447_v45  ;;  %v1578_v42 = vunpack.c.l.bf16 %v1575_v27 }
 0x339   : > { %v1541_v51 = vmul.f32 %v2449_v63, %v1539_v60  ;;  %vm1527_vm0 = vmor %vm1525_vm15, %vm1526_vm14  ;;  %vm1546_vm2 = vweird.f32 %v2449_v63  ;;  %v1616_v60 = vadd.f32 %v3530_v44, %v3327_v13 }
 0x33a   : > { %v1522_v26 = vsub.f32 1.0, %v1521_v37  ;;  %v2181_v10 = vmul.f32 -1.442695, %v1639_v7  ;;  %vm1547_vm4 = vmor %vm1545_vm3, %vm1546_vm2 }
 0x33b   : > { %v1542_v61 = vsub.f32 1.0, %v1541_v51 }
 0x33c   : > { %v1523_v28 = vmul.f32 %v2447_v45, %v1522_v26  ;;  %2452 = vpow2.f32 %v2181_v10  ;;  %v2451_v35 = vpop.eup %2450  ;;  %v1671_v10 = vpop.permute.xlu1 %1670 }
 0x33d   : > { %v1543_v53 = vmul.f32 %v2449_v63, %v1542_v61  ;;  %v1604_v30 = vpop.f32.mrf.mxu2  ;;  %v1623_v47 = vadd.f32 1.0, %v2451_v35  ;;  %vm1672_vm15 = vcmp.eq.s32.totalorder %v1671_v10, 1 }
 0x33e   : > { %v1524_v0 = vadd.f32 %v2447_v45, %v1523_v28  ;;  %v1617_v21 = vpop.f32.mrf.mxu3 }
 0x33f   : > { %2454 = vrcp.f32 %v1623_v47  ;;  %v1544_v24 = vadd.f32 %v2449_v63, %v1543_v53  ;;  %v1635_v46 = vand.u32 2147483648, %v1623_v47  ;;  %v1633_v50 = vand.u32 2147483647, %v1623_v47 }
 0x340   : > { %v1528_v34 = vsel %vm1527_vm0, %v2447_v45, %v1524_v0  ;;  %vm1629_vm7 = vweird.f32 %v1623_v47 }
 0x341   : > { %v1533_v43 = vsel %vm1530_vm1, %v1532_v11, %v1528_v34  ;;  %v1548_v16 = vsel %vm1547_vm4, %v2449_v63, %v1544_v24  ;;  %v1636_v54 = vor.u32 1.1754944e-38, %v1635_v46  ;;  %vm1634_vm9 = vcmp.eq.f32.partialorder %v1633_v50, 8.507059e+37 }
 0x342   : > { %v2453_v6 = vpop.eup %2452  ;;  %v1555_v12 = vmul.f32 %v1533_v43, %v1512_v36  ;;  %v1553_v4 = vsel %vm1550_vm5, %v1552_v22, %v1548_v16 }
 0x343   : > { %v1643_v48 = vadd.f32 1.0, %v2453_v6  ;;  %v1558_v9 = vsub.f32 1.0, %v1553_v4  ;;  %v1560_v20 = vmul.f32 %v1553_v4, %v3506_v25 }
 0x344   : > { %v1556_v62 = vadd.f32 %v1555_v12, %v1474_v3 }
 0x345   : > { %2456 = vrcp.f32 %v1643_v48  ;;  %v2455_v58 = vpop.eup %2454  ;;  %v1655_v31 = vand.u32 2147483648, %v1643_v48  ;;  %vm1649_vm12 = vweird.f32 %v1643_v48  ;;  %v1653_v63 = vand.u32 2147483647, %v1643_v48 }
 0x346   : > { %2458 = vtanh.f32 %v1556_v62  ;;  %v1625_v39 = vmul.f32 %v2455_v58, %v1623_v47  ;;  %vm1630_vm6 = vweird.f32 %v2455_v58 }
 0x347   : > { %vm1631_vm8 = vmor %vm1629_vm7, %vm1630_vm6  ;;  %v1656_v44 = vor.u32 1.1754944e-38, %v1655_v31  ;;  %vm1654_vm14 = vcmp.eq.f32.partialorder %v1653_v63, 8.507059e+37 }
 0x348   : > { %v1626_v32 = vsub.f32 1.0, %v1625_v39 }
 0x34a   : > { %v1627_v38 = vmul.f32 %v2455_v58, %v1626_v32 }
 0x34b   : > { %v2457_v18 = vpop.eup %2456 }
 0x34c   : > { %v2459_v55 = vpop.eup %2458  ;;  %v1645_v1 = vmul.f32 %v2457_v18, %v1643_v48  ;;  %v1628_v40 = vadd.f32 %v2455_v58, %v1627_v38  ;;  %vm1650_vm11 = vweird.f32 %v2457_v18 }
 0x34d   : > { %v1559_v17 = vmul.f32 %v2459_v55, %v1558_v9  ;;  %vm1651_vm13 = vmor %vm1649_vm12, %vm1650_vm11 }
 0x34e   : > { %v1646_v41 = vsub.f32 1.0, %v1645_v1  ;;  %v1632_v52 = vsel %vm1631_vm8, %v2455_v58, %v1628_v40 }
 0x34f   : > { %v1561_v59 = vadd.f32 %v1560_v20, %v1559_v17  ;;  %v1637_v8 = vsel %vm1634_vm9, %v1636_v54, %v1632_v52 }
 0x350   : > { %v1647_v49 = vmul.f32 %v2457_v18, %v1646_v41  ;;  %v1659_v45 = vmul.f32 %v1637_v8, %v1616_v60 }
 0x351   : > { %v1569_v15 = vsel %vm1568_vm10, %v1561_v59, %v3506_v25  ;;  %v1570_v23 = vsel %vm1568_vm10, %v1561_v59, 0.0 }
 0x352   : > { %2179 = vst [vmem:[%s3031_s19 + $0x18] sm:$0xff] %v1570_v23  ;;  %v1648_v57 = vadd.f32 %v2457_v18, %v1647_v49  ;;  %v1660_v37 = vadd.f32 %v1659_v45, %v1578_v42 }
 0x353   : > { %1676 = vst [vmem:[#allocation2] sm:$0xff] %v1569_v15 }
 0x354   : > { %v1652_v13 = vsel %vm1651_vm13, %v2457_v18, %v1648_v57  ;;  %2460 = vtanh.f32 %v1660_v37 }
 0x355   : > { %v1657_v7 = vsel %vm1654_vm14, %v1656_v44, %v1652_v13 }
 0x356   : > { %v1662_v51 = vsub.f32 1.0, %v1657_v7  ;;  %v1664_v19 = vmul.f32 %v1657_v7, %v3519_v14 }
 0x35a   : > { %v2461_v26 = vpop.eup %2460 }
 0x35b   : > { %v1663_v25 = vmul.f32 %v2461_v26, %v1662_v51 }
 0x35d   : > { %v1665_v61 = vadd.f32 %v1664_v19, %v1663_v25  ;;  %1681 = sbr.rel (%p2182_p13) target bundleno = 868 (0x364), region = 72 }
 0x35f   : > { %v1673_v5 = vsel %vm1672_vm15, %v1665_v61, %v3519_v14  ;;  %v1674_v28 = vsel %vm1672_vm15, %v1665_v61, 0.0 }
 0x360   : > { %1675 = vst [vmem:[%s3033_s3] sm:$0xff] %v1674_v28 }
 0x361   : > { %1677 = vst [vmem:[#allocation3] sm:$0xff] %v1673_v5 }
 0x362   : > { %1682 = vst [vmem:[#allocation15] sm:$0xff] %v1569_v15 }
 0x363   : > { %1684 = vst [vmem:[#allocation15 + $0x8] sm:$0xff] %v1673_v5 }
 0x364 PF: > { %s1716_s28 = ssub.s32 1, %s2756_s15  ;;  %s1723_s22 = sshll.u32 %s3033_s3, 4  ;;  %s1724_s22 = int_to_ptr.vmem [resolvable:$true] %s1723_s22 }
 0x365   : > { %s2242_s23 = sshll.u32 %s1716_s28, 5  ;;  %s3769_s8 = sld [smem:[#allocation55_spill]] }
 0x366   : > { %s2241_s20 = sshll.u32 %s2756_s15, 5  ;;  %s1691_s27 = scalar_lea.sflag [#allocation14], %s421_s1 }
 0x36b   : > { %s1722_s24 = scalar_lea.hbm %s3769_s8, %s2242_s23  ;;  %s2602_s3 = scalar_lea.hbm %s3769_s8, 64 }
 0x36c   : > { %s1725_s9 = sshll.u32 %s1722_s24, 4  ;;  %s1726_s9 = int_to_ptr.hbm [resolvable:$true] %s1725_s9 }
 0x36d   : > { %s2596_s25 = sshra.s32 %s1726_s9, 4  ;;  %s2597_s25 = int_to_ptr.hbm [resolvable:$true] %s2596_s25 }
 0x36e   : > { %s2598_s26 = scalar_lea.hbm %s2597_s25, 32  ;;  %p2603_p6 = scmp.lt.s32.totalorder %s2597_s25, %s3769_s8 }
 0x36f   : > { %p2599_p3 = scmp.ne.s32.totalorder %s2597_s25, %s2598_s26  ;;  %p2604_p9 = scmp.lt.s32.totalorder %s2602_s3, %s2598_s26 }
 0x371   : > { %p2600_p8 = pnand %p2599_p3, %p2978_p10  ;;  %p2605_p4 = por %p2604_p9, %p2603_p6 }
 0x373   : > { %p2601_p11 = pneg %p2600_p8 }
 0x375   : > { %p2606_p0 = pnand %p2605_p4, %p2601_p11 }
 0x377   : > { %2609 = shalt.err (!%p2606_p0)
}
 0x378   : > { %s2772_s15 = smov 128   ;;  %s2773_s23 = smov 8  }
 0x379   : > { %2262 = dma.vmem_to_hbm [thread:$0]  (%p2978_p10), %s1724_s22, 512, %s1726_s9, %s1691_s27, %s2772_s15, %s2772_s15, %s2773_s23  }
 0x37a   : > { %s3771_s5 = sld [smem:[#allocation54_spill]]  ;;  %s1704_s25 = sshll.u32 %s3031_s19, 4  ;;  %s1705_s25 = int_to_ptr.vmem [resolvable:$true] %s1704_s25 }
 0x37b   : > { %s1686_s3 = scalar_lea.sflag [#allocation6], %s2997_s7 }
 0x380   : > { %s1703_s12 = scalar_lea.hbm %s3771_s5, %s2241_s20  ;;  %s2630_s22 = scalar_lea.hbm %s3771_s5, 64 }
 0x381   : > { %s1706_s26 = sshll.u32 %s1703_s12, 4  ;;  %s1707_s26 = int_to_ptr.hbm [resolvable:$true] %s1706_s26 }
 0x382   : > { %s2624_s28 = sshra.s32 %s1707_s26, 4  ;;  %s2625_s28 = int_to_ptr.hbm [resolvable:$true] %s2624_s28 }
 0x383   : > { %s2626_s30 = scalar_lea.hbm %s2625_s28, 32  ;;  %p2631_p10 = scmp.lt.s32.totalorder %s2625_s28, %s3771_s5 }
 0x384   : > { %p2627_p5 = scmp.ne.s32.totalorder %s2625_s28, %s2626_s30  ;;  %p2632_p8 = scmp.lt.s32.totalorder %s2630_s22, %s2626_s30 }
 0x386   : > { %p2628_p13 = pnand %p2627_p5, %p2935_p7  ;;  %p2633_p11 = por %p2632_p8, %p2631_p10 }
 0x388   : > { %p2629_p3 = pneg %p2628_p13 }
 0x38a   : > { %p2634_p6 = pnand %p2633_p11, %p2629_p3 }
 0x38c   : > { %2637 = shalt.err (!%p2634_p6)
}
 0x38d   : > { %2261 = dma.vmem_to_hbm [thread:$0]  (%p2935_p7), %s1705_s25, 512, %s1707_s26, %s1686_s3, %s2772_s15, %s2772_s15, %s2773_s23  }
 0x38e   : > { %s3772_s0 = sld [smem:[#allocation56_spill]]  ;;  %s2774_s29 = smov [#allocation15]  }
 0x38f   : > { %s1739_s24 = sshll.u32 %s2774_s29, 4  ;;  %s1740_s24 = int_to_ptr.vmem [resolvable:$true] %s1739_s24 }
 0x394   : > { %s1741_s20 = sshll.u32 %s3772_s0, 4  ;;  %s1742_s20 = int_to_ptr.hbm [resolvable:$true] %s1741_s20 }
 0x395   : > { %2264 = dma.vmem_to_hbm [thread:$0]  (%p233_p2), %s1740_s24, 256, %s1742_s20, [#allocation14], %s2772_s15, %s2772_s15, %s2773_s23  }
 0x396   : > { %2719 = dma.done.wait (%p233_p2), [#allocation14], 256  }
 0x397   : > { %2721 = vsyncadd (%p233_p2), [#allocation14], 4294967040 }
 0x398 PF: > { %s3773_s1 = sld [smem:[#allocation23_spill]]  ;;  %p3775_p7 = scmp.ge.s32.totalorder %s2764_s17, 2 }
 0x39a   : > { %p2284_p9 = pnand %p3775_p7, %p2946_p1 }
 0x39c   : > { %p2285_p4 = pneg %p2284_p9 }
 0x39e   : > { %s1761_s25 = sand.u32 1, %s3773_s1  }
 0x39f   : > { %s1762_s26 = scalar_lea.sflag [#allocation6], %s1761_s25 }
 0x3a0   : > { %2723 = dma.done.wait (%p2285_p4), %s1762_s26, 512  }
 0x3a1   : > { %2725 = vsyncadd (%p2285_p4), %s1762_s26, 4294966784  ;;  %s3776_s3 = sadd.s32 4294967294, %s2764_s17   ;;  %p3778_p0 = pmov %p3775_p7 }
 0x3a2   : > { %s1771_s23 = sand.u32 1, %s3776_s3  }
 0x3a3   : > { %p2287_p2 = pnand %p3778_p0, %p2953_p12  ;;  %s1772_s18 = scalar_lea.sflag [#allocation14], %s1771_s23 }
 0x3a5   : > { %p2288_p5 = pneg %p2287_p2 }
 0x3a7   : > { %2727 = dma.done.wait (%p2288_p5), %s1772_s18, 512  }
 0x3a8   : > { %2729 = vsyncadd (%p2288_p5), %s1772_s18, 4294966784  ;;  %s33_s17 = sadd.s32 1, %s2764_s17   ;;  %s3779_s28 = sld [smem:[#allocation24_spill]] }
 0x3a9   : > { %p30_p13 = scmp.ge.s32.totalorder %s33_s17, 4   ;;  %s3780_s14 = sld [smem:[#allocation27_spill]] }
 0x3aa   : > { %s3781_s22 = sld [smem:[#allocation25_spill]]  ;;  %s3782_s30 = smov %s2736_s10 }
 0x3ab   : > { %s3783_s10 = smov %s2740_s11  ;;  %s3784_s11 = smov %s2983_s21 }
 0x3ac   : > { %s3785_s12 = smov %s2748_s13  ;;  %s3787_s15 = smov %s2760_s16 }
 0x3ad   :  { %32 = sbr.rel (!%p30_p13) target bundleno = 21 (0x15), region = 164 }
 0x3ae   : > { %s3786_s13 = smov %s3779_s28 }
 0x3b0   : > { %s3788_s16 = smov %s3781_s22 }
 0x3b2   :  { %1778 = vsyncpa [#allocation5], 1 }
 0x3b3   :  { %1780 = vsyncpa [#allocation5 + $0x1], 1 }
 0x3b4   :  { %1781 = vsyncpa [#allocation8], 1 }
 0x3b5   :  { %1783 = vsyncpa [#allocation8 + $0x1], 1 }
 0x3b6   :  { %1784 = vsyncpa [#allocation11], 1 }
 0x3b7   :  { %1785 = vsyncpa [#allocation6], 1 }
 0x3b8   :  { %1787 = vsyncpa [#allocation6 + $0x1], 1 }
 0x3b9   :  { %1788 = vsyncpa [#allocation14], 1 }
 0x3ba   :  { %1790 = vsyncpa [#allocation14 + $0x1], 1 }

</bundles_post_ra>
